<compile_context>
chip_gen: v5e
topology: v5e:2x2
jax: 0.10.0
libtpu: 0.0.40
codegen_flags: <defaults>
</compile_context>

<pallas_src>
import functools

import numpy as np

import jax
import jax.numpy as jnp
from jax.experimental import pallas as pl
from jax.experimental.pallas import tpu as pltpu

NEG_INF = -1e30


def _round_up(x, m):
    return (x + m - 1) // m * m


def _prefer_bf16_exp():
    """bf16 EUP exists on v6e / v7x; v5e (and older / unknown) stays f32."""
    try:
        kind = jax.devices()[0].device_kind.lower()
        return any(tag in kind for tag in ("v6", "v7", "7x"))
    except Exception:
        return False


# ---------------------------------------------------------------------------
# Kernel 1: node projection.  One bf16 MXU matmul against the extended weight
# W_ext = [W | W@a1 | W@a2 | 0...] (f32 accumulation).  K is stored in bf16 for
# the aggregation matmul; the k1/k2 columns are sliced out of the f32
# accumulator so the attention logits keep f32 precision.
# ---------------------------------------------------------------------------
def _proj_kernel(x_ref, w_ref, k_ref, ka_ref, *, c_out):
    k = jnp.dot(x_ref[...], w_ref[...], preferred_element_type=jnp.float32)  # [TM, Cp]
    k_ref[...] = k.astype(jnp.bfloat16)
    ka_ref[...] = k[:, c_out:c_out + 2]                                      # [TM, 2] f32 (k1, k2)


# ---------------------------------------------------------------------------
# Kernel 2: spectral-filtered attention + aggregation, tiled over target rows.
#   E[i, j] = | u1[i] + u2[i] * k2[j] |        (exact rank-2 spectral filter)
#   masked softmax over sources j, then H = alpha @ K (bf16 MXU, f32 acc).
# Only the [TILE_M, N] int8 adjacency tile is streamed per grid step.
# ---------------------------------------------------------------------------
def _attn_kernel(u1_ref, u2_ref, k2row_ref, adj_ref, kmat_ref, out_ref, *, exp_bf16):
    e = jnp.abs(u1_ref[...] + u2_ref[...] * k2row_ref[...])          # [TM, N] f32
    # leaky_relu(|.|, 0.2) is the identity on non-negative input -> skipped.
    e = jnp.where(adj_ref[...] != 0, e, NEG_INF)                     # int8 mask, no f32 cast
    m = jnp.max(e, axis=-1, keepdims=True)
    z = e - m
    if exp_bf16:                                                     # bf16 EUP (v6e / v7x)
        z = z.astype(jnp.bfloat16)
    p = jnp.exp(z)
    denom = jnp.sum(p.astype(jnp.float32), axis=-1, keepdims=True)   # f32 accumulation
    # Aggregate first (bf16 MXU, f32 acc), normalize afterwards: TM x Cp
    # multiplies instead of TM x N, and the reciprocal runs on the EUP.
    h = jnp.dot(p.astype(jnp.bfloat16), kmat_ref[...],
                preferred_element_type=jnp.float32)                  # [TM, Cp]
    # approx=True trades ~1e-3 relative error for an EUP-slot reciprocal;
    # use approx=False for tighter parity with the PyTorch module.
    out_ref[...] = h * pl.reciprocal(denom, approx=True)


# ---------------------------------------------------------------------------
# Wrapper
# ---------------------------------------------------------------------------
@functools.partial(jax.jit, static_argnames=("tile_m", "exp_bf16"))
def gatconv3_forward(x, adj, u_basis, lmbd, w, a1, a2, *, tile_m=128, exp_bf16=False):
    """Forward pass of GATConv3 (eval mode).  adj[i, j] != 0 <=> edge j -> i."""
    n, c_in = x.shape
    c_out = w.shape[1]
    assert n % tile_m == 0, "demo wrapper assumes N % tile_m == 0"
    c_pad = _round_up(max(c_out + 2, 128), 128)     # room for the folded a1/a2 columns
    f32 = jnp.float32

    # --- parameter-only preprocessing --------------------------------------
    # Extended projection weight: columns [:c_out] = W, column c_out = W@a1,
    # column c_out+1 = W@a2, rest zero-padding for lane-dense (128) stores.
    w_ext = jnp.zeros((c_in, c_pad), f32)
    w_ext = w_ext.at[:, :c_out].set(w)
    w_ext = w_ext.at[:, c_out].set(w @ a1.reshape(-1))
    w_ext = w_ext.at[:, c_out + 1].set(w @ a2.reshape(-1))
    w_ext = w_ext.astype(jnp.bfloat16)
    x_bf16 = x.astype(jnp.bfloat16)                 # half the X HBM traffic / VMEM
    adj_i8 = (adj != 0).astype(jnp.int8)            # O(N^2) input at 1 B/elem

    n_tiles = n // tile_m                           # keep >= 2 and even for v7x's 2 TCs
    cparams = pltpu.CompilerParams(
        dimension_semantics=("parallel",),          # independent row tiles
        # <= 48 MiB fits every generation (v7x has 64 MiB physical VMEM);
        # on v5e/v6e with large N, raise toward 64-100 MiB and tile_m 512-1024.
        vmem_limit_bytes=48 * 1024 * 1024,
    )

    # ---- pass 1: projection (K in bf16, [k1 k2] in f32) --------------------
    k_ext, ka = pl.pallas_call(
        functools.partial(_proj_kernel, c_out=c_out),
        grid=(n_tiles,),
        in_specs=[
            pl.BlockSpec((tile_m, c_in), lambda i: (i, 0)),
            pl.BlockSpec((c_in, c_pad), lambda i: (0, 0)),
        ],
        out_specs=[
            pl.BlockSpec((tile_m, c_pad), lambda i: (i, 0)),
            pl.BlockSpec((tile_m, 2), lambda i: (i, 0)),
        ],
        out_shape=[
            jax.ShapeDtypeStruct((n, c_pad), jnp.bfloat16),
            jax.ShapeDtypeStruct((n, 2), f32),
        ],
        compiler_params=cparams,
    )(x_bf16, w_ext)

    # ---- rank-2 spectral filter, factored (G is never materialized) --------
    #   u1 = G @ k1 = U @ (lmbd * (U^T @ k1)),  u2 = G @ 1 (parameter-only)
    k1 = ka[:, 0:1]                                   # [N, 1] f32
    k2 = ka[:, 1:2]                                   # [N, 1] f32
    lm = lmbd.reshape(n, 1).astype(f32)
    u1 = u_basis @ (lm * (u_basis.T @ k1))            # [N, 1]
    u2 = u_basis @ (lm * (u_basis.T @ jnp.ones((n, 1), f32)))  # [N, 1]
    k2_row = k2.reshape(1, n)                         # lane-major for source broadcast

    # ---- pass 2: attention + aggregation, tiled over target-node rows ------
    h_pad = pl.pallas_call(
        functools.partial(_attn_kernel, exp_bf16=exp_bf16),
        grid=(n_tiles,),
        in_specs=[
            pl.BlockSpec((tile_m, 1), lambda i: (i, 0)),      # u1 = (G k1) row tile
            pl.BlockSpec((tile_m, 1), lambda i: (i, 0)),      # u2 = rowsum(G) row tile
            pl.BlockSpec((1, n), lambda i: (0, 0)),           # k2^T (resident, f32)
            pl.BlockSpec((tile_m, n), lambda i: (i, 0)),      # adjacency mask (int8)
            pl.BlockSpec((n, c_pad), lambda i: (0, 0)),       # K (resident, bf16)
        ],
        out_specs=pl.BlockSpec((tile_m, c_pad), lambda i: (i, 0)),   # lane-dense (128)
        out_shape=jax.ShapeDtypeStruct((n, c_pad), f32),
        compiler_params=cparams,
    )(u1, u2, k2_row, adj_i8, k_ext)

    # Folded a1/a2 columns (and zero padding) are sliced off here.
    return h_pad[:, :c_out]


# ---------------------------------------------------------------------------
# Pure-JAX reference (module-faithful structure: dense GFT on the [N, N] E,
# softmax, then @K), using the same bf16-operand / f32-accumulate MXU policy.
# ---------------------------------------------------------------------------
def gatconv3_reference(x, adj, u_basis, lmbd, w, a1, a2, negative_slope=0.2):
    n = x.shape[0]
    k = jnp.dot(x.astype(jnp.bfloat16), w.astype(jnp.bfloat16),
                preferred_element_type=jnp.float32)
    k1 = k @ a1.reshape(-1, 1)
    k2 = k @ a2.reshape(-1, 1)
    e = k1 + k2.reshape(1, n)
    e = u_basis @ (lmbd * (u_basis.T @ e))          # igft(lmbd * gft(E))
    e = jnp.abs(e)
    e = jnp.where(e > 0, e, negative_slope * e)     # leaky_relu (identity here)
    e = jnp.where(adj != 0, e, NEG_INF)
    alpha = jax.nn.softmax(e, axis=-1)              # dropout(p=0.0) == identity
    return jnp.dot(alpha.astype(jnp.bfloat16), k.astype(jnp.bfloat16),
                   preferred_element_type=jnp.float32)


# ---------------------------------------------------------------------------
# Deterministic demo inputs
# ---------------------------------------------------------------------------
def build_graph(n):
    """Ring graph (i <-> i+1) + self loops.  Returns (int8 adjacency mask,
    orthonormal GFT basis U = eigenvectors of the combinatorial Laplacian)."""
    a = np.zeros((n, n), np.float64)
    idx = np.arange(n)
    a[idx, (idx + 1) % n] = 1.0
    a[(idx + 1) % n, idx] = 1.0
    lap = np.diag(a.sum(1)) - a
    _, u = np.linalg.eigh(lap)
    adj_mask = (a + np.eye(n)) > 0                  # self loops => no empty softmax rows
    return jnp.asarray(adj_mask, dtype=jnp.int8), jnp.asarray(u, dtype=jnp.float32)


def init_params(key, n, c_in, c_out):
    """Kaiming-uniform style init, matching the module's _set_parameters."""
    k_w, k_a1, k_a2, k_l = jax.random.split(key, 4)

    def kaiming_uniform(k, shape, fan_in):
        bound = float(np.sqrt(6.0 / fan_in))
        return jax.random.uniform(k, shape, jnp.float32, -bound, bound)

    w = kaiming_uniform(k_w, (c_in, c_out), c_in)       # = W.weight^T
    a1 = kaiming_uniform(k_a1, (c_out,), c_out)         # = a_1.weight
    a2 = kaiming_uniform(k_a2, (c_out,), c_out)         # = a_2.weight
    lmbd = kaiming_uniform(k_l, (n, 1), 1)              # module hard-codes 2708; sized to N here
    return w, a1, a2, lmbd


if __name__ == "__main__":
    N, C_IN, C_OUT, TILE_M = 256, 32, 64, 128

    key = jax.random.PRNGKey(0)
    k_x, k_p = jax.random.split(key)

    x = jax.random.normal(k_x, (N, C_IN), dtype=jnp.float32)
    adj, u_basis = build_graph(N)
    w, a1, a2, lmbd = init_params(k_p, N, C_IN, C_OUT)

    exp_bf16 = _prefer_bf16_exp()                     # bf16 EUP only on v6e / v7x
    h = gatconv3_forward(x, adj, u_basis, lmbd, w, a1, a2,
                         tile_m=TILE_M, exp_bf16=exp_bf16)
    h = jax.block_until_ready(h)

    assert h.shape == (N, C_OUT)
    assert bool(jnp.all(jnp.isfinite(h)))

    # Norm-based parity check: elementwise parity is limited by the bf16
    # rounding of the folded a_1/a_2 weight columns feeding the softmax logits
    # (review item 3 / its correctness notes) plus the bf16 MXU + approx
    # reciprocal policy, so bound the relative Frobenius error (and a loose
    # per-element cap) instead of a tight per-element allclose.
    h_ref = gatconv3_reference(x, adj, u_basis, lmbd, w, a1, a2)
    rel_err = float(jnp.linalg.norm(h - h_ref) / jnp.linalg.norm(h_ref))
    max_abs = float(jnp.max(jnp.abs(h - h_ref)))
    assert rel_err < 5e-2, f"relative Frobenius error vs reference: {rel_err}"
    assert max_abs < 0.5, f"max abs diff vs reference: {max_abs}"

    print("KERNEL_OK")
</pallas_src>

<mosaic_0001>
module attributes {stable_mosaic.version = 11 : i64} {
  func.func @_proj_kernel(%arg0: i32, %arg1: memref<128x32xbf16, #tpu.memory_space<vmem>>, %arg2: memref<32x128xbf16, #tpu.memory_space<vmem>>, %arg3: memref<128x128xbf16, #tpu.memory_space<vmem>>, %arg4: memref<128x2xf32, #tpu.memory_space<vmem>>) attributes {dimension_semantics = [#tpu.dimension_semantics<parallel>], iteration_bounds = array<i64: 2>, scalar_prefetch = 0 : i64, scratch_operands = 0 : i64, tpu.core_type = #tpu.core_type<tc>, window_params = [{transform_indices = @transform_0, window_bounds = array<i64: 128, 32>}, {pipeline_mode = #tpu.pipeline_mode<synchronous>, transform_indices = @transform_1, window_bounds = array<i64: 32, 128>}, {transform_indices = @transform_2, window_bounds = array<i64: 128, 128>}, {transform_indices = @transform_3, window_bounds = array<i64: 128, 2>}]} {
    %c0 = arith.constant 0 : index
    %c0_0 = arith.constant 0 : index
    %0 = vector.load %arg1[%c0, %c0_0] : memref<128x32xbf16, #tpu.memory_space<vmem>>, vector<128x32xbf16>
    %c0_1 = arith.constant 0 : index
    %c0_2 = arith.constant 0 : index
    %1 = vector.load %arg2[%c0_1, %c0_2] : memref<32x128xbf16, #tpu.memory_space<vmem>>, vector<32x128xbf16>
    %cst = arith.constant dense<0.000000e+00> : vector<128x128xf32>
    %2 = tpu.matmul %0, %1, %cst {dimension_numbers = #tpu.dot_dimension_numbers<[1], [0], [0], [1], [0, 0, 1, 1], [], []>} : vector<128x32xbf16>, vector<32x128xbf16>, vector<128x128xf32> -> vector<128x128xf32>
    %3 = arith.truncf %2 : vector<128x128xf32> to vector<128x128xbf16>
    %c0_3 = arith.constant 0 : index
    %c0_4 = arith.constant 0 : index
    %4 = vector.load %arg3[%c0_3, %c0_4] : memref<128x128xbf16, #tpu.memory_space<vmem>>, vector<128x128xbf16>
    tpu.vector_store %arg3[%c0_3, %c0_4], %3 {strides = array<i32>} : memref<128x128xbf16, #tpu.memory_space<vmem>>, vector<128x128xbf16>,
    %5 = vector.extract_strided_slice %2 {offsets = [0, 64], sizes = [128, 2], strides = [1, 1]} : vector<128x128xf32> to vector<128x2xf32>
    %c0_5 = arith.constant 0 : index
    %c0_6 = arith.constant 0 : index
    %6 = vector.load %arg4[%c0_5, %c0_6] : memref<128x2xf32, #tpu.memory_space<vmem>>, vector<128x2xf32>
    tpu.vector_store %arg4[%c0_5, %c0_6], %5 {strides = array<i32>} : memref<128x2xf32, #tpu.memory_space<vmem>>, vector<128x2xf32>,
    return
  }
  func.func @transform_0(%arg0: i32) -> (i32, i32) {
    %c0_i32 = arith.constant 0 : i32
    %c0_i32_0 = arith.constant 0 : i32
    return %arg0, %c0_i32 : i32, i32
  }
  func.func @transform_1(%arg0: i32) -> (i32, i32) {
    %c0_i32 = arith.constant 0 : i32
    %c0_i32_0 = arith.constant 0 : i32
    %c0_i32_1 = arith.constant 0 : i32
    return %c0_i32, %c0_i32_0 : i32, i32
  }
  func.func @transform_2(%arg0: i32) -> (i32, i32) {
    %c0_i32 = arith.constant 0 : i32
    %c0_i32_0 = arith.constant 0 : i32
    return %arg0, %c0_i32 : i32, i32
  }
  func.func @transform_3(%arg0: i32) -> (i32, i32) {
    %c0_i32 = arith.constant 0 : i32
    %c0_i32_0 = arith.constant 0 : i32
    return %arg0, %c0_i32 : i32, i32
  }
}

module attributes {stable_mosaic.version = 11 : i64} {
  func.func @_attn_kernel(%arg0: i32, %arg1: memref<128x1xf32, #tpu.memory_space<vmem>>, %arg2: memref<128x1xf32, #tpu.memory_space<vmem>>, %arg3: memref<1x256xf32, #tpu.memory_space<vmem>>, %arg4: memref<128x256xi8, #tpu.memory_space<vmem>>, %arg5: memref<256x128xbf16, #tpu.memory_space<vmem>>, %arg6: memref<128x128xf32, #tpu.memory_space<vmem>>) attributes {dimension_semantics = [#tpu.dimension_semantics<parallel>], iteration_bounds = array<i64: 2>, scalar_prefetch = 0 : i64, scratch_operands = 0 : i64, tpu.core_type = #tpu.core_type<tc>, window_params = [{transform_indices = @transform_0, window_bounds = array<i64: 128, 1>}, {transform_indices = @transform_1, window_bounds = array<i64: 128, 1>}, {pipeline_mode = #tpu.pipeline_mode<synchronous>, transform_indices = @transform_2, window_bounds = array<i64: 1, 256>}, {transform_indices = @transform_3, window_bounds = array<i64: 128, 256>}, {pipeline_mode = #tpu.pipeline_mode<synchronous>, transform_indices = @transform_4, window_bounds = array<i64: 256, 128>}, {transform_indices = @transform_5, window_bounds = array<i64: 128, 128>}]} {
    %c0 = arith.constant 0 : index
    %c0_0 = arith.constant 0 : index
    %0 = vector.load %arg1[%c0, %c0_0] : memref<128x1xf32, #tpu.memory_space<vmem>>, vector<128x1xf32>
    %c0_1 = arith.constant 0 : index
    %c0_2 = arith.constant 0 : index
    %1 = vector.load %arg2[%c0_1, %c0_2] : memref<128x1xf32, #tpu.memory_space<vmem>>, vector<128x1xf32>
    %c0_3 = arith.constant 0 : index
    %c0_4 = arith.constant 0 : index
    %2 = vector.load %arg3[%c0_3, %c0_4] : memref<1x256xf32, #tpu.memory_space<vmem>>, vector<1x256xf32>
    %3 = vector.broadcast %1 : vector<128x1xf32> to vector<128x256xf32>
    %4 = vector.broadcast %2 : vector<1x256xf32> to vector<128x256xf32>
    %5 = arith.mulf %3, %4 : vector<128x256xf32>
    %6 = vector.broadcast %0 : vector<128x1xf32> to vector<128x256xf32>
    %7 = arith.addf %6, %5 : vector<128x256xf32>
    %8 = math.absf %7 : vector<128x256xf32>
    %c0_5 = arith.constant 0 : index
    %c0_6 = arith.constant 0 : index
    %9 = vector.load %arg4[%c0_5, %c0_6] : memref<128x256xi8, #tpu.memory_space<vmem>>, vector<128x256xi8>
    %c0_i8 = arith.constant 0 : i8
    %10 = vector.broadcast %c0_i8 : i8 to vector<128x256xi8>
    %11 = arith.cmpi ne, %9, %10 : vector<128x256xi8>
    %cst = arith.constant -1.000000e+30 : f32
    %12 = vector.broadcast %cst : f32 to vector<128x256xf32>
    %13 = arith.select %11, %8, %12 : vector<128x256xi1>, vector<128x256xf32>
    %cst_7 = arith.constant dense<0xFF800000> : vector<128xf32>
    %14 = vector.multi_reduction <maximumf>, %13, %cst_7 [1] : vector<128x256xf32> to vector<128xf32>
    %15 = vector.shape_cast %14 : vector<128xf32> to vector<128x1xf32>
    %16 = vector.broadcast %15 : vector<128x1xf32> to vector<128x256xf32>
    %17 = arith.subf %13, %16 : vector<128x256xf32>
    %18 = math.exp %17 : vector<128x256xf32>
    %cst_8 = arith.constant dense<0.000000e+00> : vector<128xf32>
    %19 = vector.multi_reduction <add>, %18, %cst_8 [1] : vector<128x256xf32> to vector<128xf32>
    %20 = vector.shape_cast %19 : vector<128xf32> to vector<128x1xf32>
    %21 = arith.truncf %18 : vector<128x256xf32> to vector<128x256xbf16>
    %c0_9 = arith.constant 0 : index
    %c0_10 = arith.constant 0 : index
    %22 = vector.load %arg5[%c0_9, %c0_10] : memref<256x128xbf16, #tpu.memory_space<vmem>>, vector<256x128xbf16>
    %cst_11 = arith.constant dense<0.000000e+00> : vector<128x128xf32>
    %23 = tpu.matmul %21, %22, %cst_11 {dimension_numbers = #tpu.dot_dimension_numbers<[1], [0], [0], [1], [0, 0, 1, 1], [], []>} : vector<128x256xbf16>, vector<256x128xbf16>, vector<128x128xf32> -> vector<128x128xf32>
    %24 = tpu.reciprocal %20 {approx = true} : vector<128x1xf32> -> vector<128x1xf32>
    %25 = vector.broadcast %24 : vector<128x1xf32> to vector<128x128xf32>
    %26 = arith.mulf %23, %25 : vector<128x128xf32>
    %c0_12 = arith.constant 0 : index
    %c0_13 = arith.constant 0 : index
    %27 = vector.load %arg6[%c0_12, %c0_13] : memref<128x128xf32, #tpu.memory_space<vmem>>, vector<128x128xf32>
    tpu.vector_store %arg6[%c0_12, %c0_13], %26 {strides = array<i32>} : memref<128x128xf32, #tpu.memory_space<vmem>>, vector<128x128xf32>,
    return
  }
  func.func @transform_0(%arg0: i32) -> (i32, i32) {
    %c0_i32 = arith.constant 0 : i32
    %c0_i32_0 = arith.constant 0 : i32
    return %arg0, %c0_i32 : i32, i32
  }
  func.func @transform_1(%arg0: i32) -> (i32, i32) {
    %c0_i32 = arith.constant 0 : i32
    %c0_i32_0 = arith.constant 0 : i32
    return %arg0, %c0_i32 : i32, i32
  }
  func.func @transform_2(%arg0: i32) -> (i32, i32) {
    %c0_i32 = arith.constant 0 : i32
    %c0_i32_0 = arith.constant 0 : i32
    %c0_i32_1 = arith.constant 0 : i32
    return %c0_i32, %c0_i32_0 : i32, i32
  }
  func.func @transform_3(%arg0: i32) -> (i32, i32) {
    %c0_i32 = arith.constant 0 : i32
    %c0_i32_0 = arith.constant 0 : i32
    return %arg0, %c0_i32 : i32, i32
  }
  func.func @transform_4(%arg0: i32) -> (i32, i32) {
    %c0_i32 = arith.constant 0 : i32
    %c0_i32_0 = arith.constant 0 : i32
    %c0_i32_1 = arith.constant 0 : i32
    return %c0_i32, %c0_i32_0 : i32, i32
  }
  func.func @transform_5(%arg0: i32) -> (i32, i32) {
    %c0_i32 = arith.constant 0 : i32
    %c0_i32_0 = arith.constant 0 : i32
    return %arg0, %c0_i32 : i32, i32
  }
}

</mosaic_0001>

<bundles_post_ra>
// kernel: gatconv3_forward.2
= control target key start
LH: loop header
LB: loop body
LE: loop exit
PB: predicated region body
PF: predicated region fallthrough
CT: control target
= control target key end

     0   :  { %s700_s12 = smov 0   ;;  %s802_s0 = inlined_call_operand.vmem [shape: bf16[256,32], index: 0, kind: input, shape index: {}]   ;;  %s803_s1 = inlined_call_operand.vmem [shape: bf16[32,128], index: 1, kind: input, shape index: {}]   ;;  %s804_s2 = inlined_call_operand.vmem [shape: bf16[256,128], index: 2, kind: output, shape index: {0}]   ;;  %s805_s3 = inlined_call_operand.vmem [shape: f32[256,2], index: 3, kind: output, shape index: {1}]  }
   0x1 LB: > { %s538_s13 = sadd.s32 4294967295, %s677_s12   ;;  %p542_p0 = scmp.ge.s32.totalorder %s677_s12, 1  ;;  %s677_s12 = sphi %s700_s12, %s14_s12  }
   0x2   : > { %p141_p1 = scmp.lt.s32.totalorder %s677_s12, 3 }
   0x4   : > { %p142_p2 = pnand %p542_p0, %p141_p1 }
   0x5   : > { %s543_s16 = sshll.u32 (!%p142_p2), %s538_s13, 4  ;;  %s679_s23 = smov (!%p142_p2), 64  }
   0x6   : > { %145 = sbr.rel (%p142_p2) target bundleno = 310 (0x136), region = 28  ;;  %p171_p3 = scmp.lt.s32.totalorder (!%p142_p2), %s543_s16, 31 }
   0xb   : > { %v608_v0 = vld [vmem:[%s803_s1 + $0x8] sm:$0xff]  ;;  %v607_v1 = vld [vmem:[%s803_s1] sm:$0xff]  ;;  %s807_s16 = smov (!%p171_p3, %s543_s16), 31  ;;  %vm261_vm0 = vcmask 261120   ;;  %vm431_vm1 = vcmask 15360  }
   0xc   : > { %292 = vmatpush.bf16.msra.mxu0 %v608_v0  ;;  %656 = vmatpush.bf16.msra.mxu1 %v608_v0  ;;  %s544_s19 = sshll.u32 %s807_s16, 2  ;;  %s548_s27 = sshll.u32 %s807_s16, 3 }
   0xd   : > { %657 = vmatpush.bf16.msra.mxu2 %v608_v0  ;;  %658 = vmatpush.bf16.msra.mxu3 %v608_v0  ;;  %s174_s22 = scalar_lea.vmem %s802_s0, %s544_s19  ;;  %s737_s26 = scalar_lea.vmem %s804_s2, %s544_s19 }
   0xe   : > { %v599_v2 = vld [vmem:[%s174_s22] sm:$0xff]  ;;  %v601_v3 = vld [vmem:[%s174_s22 + $0x10] sm:$0xff]  ;;  %v600_v6 = vld [vmem:[%s174_s22 + $0x8] sm:$0xff]  ;;  %s765_s30 = scalar_lea.vmem %s805_s3, %s548_s27 }
   0xf   : > { %v603_v4 = vld [vmem:[%s174_s22 + $0x20] sm:$0xff]  ;;  %v605_v5 = vld [vmem:[%s174_s22 + $0x30] sm:$0xff]  ;;  %v602_v7 = vld [vmem:[%s174_s22 + $0x18] sm:$0xff] }
  0x10   : > { %293 = vmatpush.bf16.msra.mxu0 %v607_v1  ;;  %659 = vmatpush.bf16.msra.mxu1 %v607_v1  ;;  %v604_v8 = vld [vmem:[%s174_s22 + $0x28] sm:$0xff]  ;;  %v606_v9 = vld [vmem:[%s174_s22 + $0x38] sm:$0xff] }
  0x11   : > { %660 = vmatpush.bf16.msra.mxu2 %v607_v1  ;;  %661 = vmatpush.bf16.msra.mxu3 %v607_v1 }
  0x13   : > { %589 = vmatmul.msk.bf16.vlgmr.msra.gmra.mxu0 %vm261_vm0, %v599_v2  ;;  %591 = vmatmul.msk.bf16.vlgmr.msra.gmra.mxu1 %vm261_vm0, %v601_v3 }
  0x14   : > { %593 = vmatmul.msk.bf16.vlgmr.msra.gmra.mxu2 %vm261_vm0, %v603_v4  ;;  %595 = vmatmul.msk.bf16.vlgmr.msra.gmra.mxu3 %vm261_vm0, %v605_v5 }
  0x23   : > { %590 = vmatmul.msk.bf16.gmra.mxu0 %vm261_vm0, %v600_v6  ;;  %592 = vmatmul.msk.bf16.gmra.mxu1 %vm261_vm0, %v602_v7 }
  0x24   : > { %594 = vmatmul.msk.bf16.gmra.mxu2 %vm261_vm0, %v604_v8  ;;  %596 = vmatmul.msk.bf16.gmra.mxu3 %vm261_vm0, %v606_v9 }
  0x90   : > { %v295_v10 = vpop.f32.mrf.mxu0  ;;  %v305_v11 = vpop.f32.mrf.mxu1 }
  0x91   : > { %391 = vrot.lane.b32.xlu2 %v305_v11, %s679_s23  ;;  %383 = vrot.lane.b32.xlu0 %v295_v10, %s679_s23 }
  0x97   : > { %v315_v12 = vpop.f32.mrf.mxu2  ;;  %v325_v13 = vpop.f32.mrf.mxu3 }
  0x98   : > { %v297_v14 = vpop.f32.mrf.mxu0  ;;  %v307_v15 = vpop.f32.mrf.mxu1 }
  0x99   : > { %v612_v16 = vpack.c.bf16 %v297_v14, %v295_v10  ;;  %399 = vrot.lane.b32.xlu2 %v315_v12, %s679_s23  ;;  %407 = vrot.lane.b32.xlu0 %v325_v13, %s679_s23  ;;  %v622_v17 = vpack.c.bf16 %v307_v15, %v305_v11 }
  0x9b   : > { %613 = vst [vmem:[%s737_s26] sm:$0xff] %v612_v16  }
  0x9c   : > { %650 = vst [vmem:[%s737_s26 + $0x10] sm:$0xff] %v622_v17  }
  0x9f   : > { %v317_v18 = vpop.f32.mrf.mxu2  ;;  %v327_v19 = vpop.f32.mrf.mxu3 }
  0xa0   : > { %v632_v20 = vpack.c.bf16 %v317_v18, %v315_v12  ;;  %v300_v21 = vpop.f32.mrf.mxu0  ;;  %v642_v22 = vpack.c.bf16 %v327_v19, %v325_v13  ;;  %v310_v23 = vpop.f32.mrf.mxu1 }
  0xa1   : > { %393 = vrot.lane.b32.xlu2 %v307_v15, %s679_s23  ;;  %385 = vrot.lane.b32.xlu0 %v297_v14, %s679_s23 }
  0xa2   : > { %652 = vst [vmem:[%s737_s26 + $0x20] sm:$0xff] %v632_v20   ;;  %387 = vrot.lane.b32.xlu1 %v300_v21, %s679_s23 }
  0xa3   : > { %654 = vst [vmem:[%s737_s26 + $0x30] sm:$0xff] %v642_v22  }
  0xa7   : > { %v320_v24 = vpop.f32.mrf.mxu2  ;;  %v330_v25 = vpop.f32.mrf.mxu3 }
  0xa8   : > { %v302_v26 = vpop.f32.mrf.mxu0  ;;  %v312_v27 = vpop.f32.mrf.mxu1 }
  0xa9   : > { %v617_v28 = vpack.c.bf16 %v302_v26, %v300_v21  ;;  %401 = vrot.lane.b32.xlu0 %v317_v18, %s679_s23  ;;  %v627_v29 = vpack.c.bf16 %v312_v27, %v310_v23 }
  0xaa   : > { %403 = vrot.lane.b32.xlu1 %v320_v24, %s679_s23 }
  0xab   : > { %649 = vst [vmem:[%s737_s26 + $0x8] sm:$0xff] %v617_v28  }
  0xac   : > { %651 = vst [vmem:[%s737_s26 + $0x18] sm:$0xff] %v627_v29  }
  0xaf   : > { %v322_v30 = vpop.f32.mrf.mxu2  ;;  %v332_v31 = vpop.f32.mrf.mxu3 }
  0xb0   : > { %v637_v32 = vpack.c.bf16 %v322_v30, %v320_v24  ;;  %405 = vrot.lane.b32.xlu2 %v322_v30, %s679_s23  ;;  %v647_v33 = vpack.c.bf16 %v332_v31, %v330_v25 }
  0xb1   : > { %395 = vrot.lane.b32.xlu0 %v310_v23, %s679_s23 }
  0xb2   : > { %653 = vst [vmem:[%s737_s26 + $0x28] sm:$0xff] %v637_v32   ;;  %389 = vrot.lane.b32.xlu1 %v302_v26, %s679_s23 }
  0xb3   : > { %655 = vst [vmem:[%s737_s26 + $0x38] sm:$0xff] %v647_v33  }
  0xb8   : > { %411 = vrot.lane.b32.xlu2 %v330_v25, %s679_s23 }
  0xb9   : > { %413 = vrot.lane.b32.xlu0 %v332_v31, %s679_s23 }
  0xba   : > { %397 = vrot.lane.b32.xlu1 %v312_v27, %s679_s23 }
  0xc2   : > { %409 = vrot.lane.b32.xlu1 %v327_v19, %s679_s23 }
  0xeb   : > { %v392_v34 = vpop.permute.xlu2 %391 }
  0xec   : > { %436 = vst.msk [vmem:[%s765_s30 + $0x20] sm:$0xff] %vm431_vm1, %v392_v34 }
  0xf3   : > { %v400_v35 = vpop.permute.xlu2 %399 }
  0xf4   : > { %440 = vst.msk [vmem:[%s765_s30 + $0x40] sm:$0xff] %vm431_vm1, %v400_v35 }
  0xfb   : > { %v394_v36 = vpop.permute.xlu2 %393 }
  0xfc   : > { %437 = vst.msk [vmem:[%s765_s30 + $0x28] sm:$0xff] %vm431_vm1, %v394_v36 }
 0x103   : > { %v384_v37 = vpop.permute.xlu0 %383 }
 0x104   : > { %432 = vst.msk [vmem:[%s765_s30] sm:$0xff] %vm431_vm1, %v384_v37 }
 0x10a   : > { %v406_v38 = vpop.permute.xlu2 %405 }
 0x10b   : > { %443 = vst.msk [vmem:[%s765_s30 + $0x58] sm:$0xff] %vm431_vm1, %v406_v38  ;;  %v408_v39 = vpop.permute.xlu0 %407 }
 0x10c   : > { %444 = vst.msk [vmem:[%s765_s30 + $0x60] sm:$0xff] %vm431_vm1, %v408_v39 }
 0x112   : > { %v412_v40 = vpop.permute.xlu2 %411 }
 0x113   : > { %446 = vst.msk [vmem:[%s765_s30 + $0x70] sm:$0xff] %vm431_vm1, %v412_v40  ;;  %v386_v41 = vpop.permute.xlu0 %385 }
 0x114   : > { %433 = vst.msk [vmem:[%s765_s30 + $0x8] sm:$0xff] %vm431_vm1, %v386_v41  ;;  %v388_v42 = vpop.permute.xlu1 %387 }
 0x115   : > { %434 = vst.msk [vmem:[%s765_s30 + $0x10] sm:$0xff] %vm431_vm1, %v388_v42 }
 0x11b   : > { %v402_v43 = vpop.permute.xlu0 %401 }
 0x11c   : > { %441 = vst.msk [vmem:[%s765_s30 + $0x48] sm:$0xff] %vm431_vm1, %v402_v43  ;;  %v404_v44 = vpop.permute.xlu1 %403 }
 0x11d   : > { %442 = vst.msk [vmem:[%s765_s30 + $0x50] sm:$0xff] %vm431_vm1, %v404_v44 }
 0x123   : > { %v396_v45 = vpop.permute.xlu0 %395 }
 0x124   : > { %438 = vst.msk [vmem:[%s765_s30 + $0x30] sm:$0xff] %vm431_vm1, %v396_v45  ;;  %v390_v46 = vpop.permute.xlu1 %389 }
 0x125   : > { %435 = vst.msk [vmem:[%s765_s30 + $0x18] sm:$0xff] %vm431_vm1, %v390_v46 }
 0x12b   : > { %v414_v47 = vpop.permute.xlu0 %413 }
 0x12c   : > { %447 = vst.msk [vmem:[%s765_s30 + $0x78] sm:$0xff] %vm431_vm1, %v414_v47  ;;  %v398_v48 = vpop.permute.xlu1 %397 }
 0x12d   : > { %439 = vst.msk [vmem:[%s765_s30 + $0x38] sm:$0xff] %vm431_vm1, %v398_v48 }
 0x134   : > { %v410_v49 = vpop.permute.xlu1 %409 }
 0x135   : > { %445 = vst.msk [vmem:[%s765_s30 + $0x68] sm:$0xff] %vm431_vm1, %v410_v49 }
 0x136 PF: > { %s14_s12 = sadd.s32 1, %s677_s12  }
 0x137   : > { %p11_p4 = scmp.ge.s32.totalorder %s14_s12, 4  }
 0x139   :  { %13 = sbr.rel (!%p11_p4) target bundleno = 1 (0x1), region = 70 }

// kernel: gatconv3_forward.3
= control target key start
LH: loop header
LB: loop body
LE: loop exit
PB: predicated region body
PF: predicated region fallthrough
CT: control target
= control target key end

     0   :  { %s1609_s18 = smov 0   ;;  %s2121_s0 = inlined_call_operand.vmem [shape: f32[256,1], index: 0, kind: input, shape index: {}]   ;;  %s2122_s1 = inlined_call_operand.vmem [shape: f32[256,1], index: 1, kind: input, shape index: {}]   ;;  %s2123_s2 = inlined_call_operand.vmem [shape: f32[1,256], index: 2, kind: input, shape index: {}]   ;;  %s2124_s3 = inlined_call_operand.vmem [shape: s8[256,256], index: 3, kind: input, shape index: {}]   ;;  %s2125_s4 = inlined_call_operand.vmem [shape: bf16[256,128], index: 4, kind: input, shape index: {}]   ;;  %s2126_s5 = inlined_call_operand.vmem [shape: f32[256,128], index: 5, kind: output, shape index: {}]  }
   0x1 LB: > { %s1349_s19 = sadd.s32 4294967295, %s1576_s18   ;;  %p1353_p0 = scmp.ge.s32.totalorder %s1576_s18, 1  ;;  %s1576_s18 = sphi %s1609_s18, %s15_s18  }
   0x2   : > { %p211_p1 = scmp.lt.s32.totalorder %s1576_s18, 3 }
   0x4   : > { %p212_p2 = pnand %p1353_p0, %p211_p1 }
   0x5   : > { %s1354_s20 = sshll.u32 (!%p212_p2), %s1349_s19, 4  ;;  %s1358_s28 = sshll.u32 (!%p212_p2), %s1349_s19, 2 }
   0x6   : > { %215 = sbr.rel (%p212_p2) target bundleno = 566 (0x236), region = 40  ;;  %p251_p3 = scmp.lt.s32.totalorder (!%p212_p2), %s1354_s20, 31 }
   0x7   : > { %p263_p4 = scmp.lt.s32.totalorder (!%p212_p2), %s1358_s28, 7 }
   0xb   : > { %v1578_v0 = vmov 0   ;;  %s2148_s20 = smov (!%p251_p3, %s1354_s20), 31  ;;  %s2150_s28 = smov (!%p263_p4, %s1358_s28), 7  ;;  %v309_v52 = vld [vmem:[%s2123_s2] sm:$0x3] }
   0xc   : > { %1473 = vset.pattern.permute.xlu2 %v1578_v0  ;;  %1472 = vset.pattern.permute.xlu1 %v1578_v0  ;;  %s1622_s21 = sshll.u32 %s2148_s20, 3  ;;  %s1429_s29 = sshll.u32 %s2150_s28, 4  ;;  %v1698_v58 = vperm.slane %v309_v52, 0  ;;  %v1700_v59 = vperm.slane %v309_v52, 1 }
   0xd   : > { %1471 = vset.pattern.permute.xlu0 %v1578_v0  ;;  %s1628_s24 = scalar_lea.vmem %s2122_s1, %s1622_s21  ;;  %s1634_s27 = scalar_lea.vmem %s2121_s0, %s1622_s21 }
   0xe   : > { %v301_v1 = vld [vmem:[%s1628_s24 + $0x40] sm:$0xff]  ;;  %v302_v4 = vld [vmem:[%s1628_s24 + $0x48] sm:$0xff]  ;;  %v303_v7 = vld [vmem:[%s1628_s24 + $0x50] sm:$0xff]  ;;  %s1669_s7 = scalar_lea.vmem %s2124_s3, %s1429_s29  ;;  %s2092_s23 = scalar_lea.vmem %s2126_s5, %s1622_s21 }
   0xf   : > { %v293_v2 = vld [vmem:[%s1628_s24] sm:$0xff]  ;;  %352 = vperm.xlu0 %1471, %v301_v1   ;;  %v294_v5 = vld [vmem:[%s1628_s24 + $0x8] sm:$0xff]  ;;  %v288_v10 = vld [vmem:[%s1634_s27 + $0x58] sm:$0xff] }
  0x10   : > { %v285_v3 = vld [vmem:[%s1634_s27 + $0x40] sm:$0xff]  ;;  %312 = vperm.xlu2 %1473, %v293_v2   ;;  %v286_v6 = vld [vmem:[%s1634_s27 + $0x48] sm:$0xff]  ;;  %v304_v11 = vld [vmem:[%s1628_s24 + $0x58] sm:$0xff] }
  0x11   : > { %469 = vperm.xlu1 %1472, %v285_v3   ;;  %v277_v8 = vld [vmem:[%s1634_s27] sm:$0xff]  ;;  %v278_v9 = vld [vmem:[%s1634_s27 + $0x8] sm:$0xff]  ;;  %v287_v12 = vld [vmem:[%s1634_s27 + $0x50] sm:$0xff] }
  0x12   : > { %v279_v13 = vld [vmem:[%s1634_s27 + $0x10] sm:$0xff]  ;;  %v296_v15 = vld [vmem:[%s1628_s24 + $0x18] sm:$0xff]  ;;  %v306_v16 = vld [vmem:[%s1628_s24 + $0x68] sm:$0xff] }
  0x13   : > { %v295_v14 = vld [vmem:[%s1628_s24 + $0x10] sm:$0xff]  ;;  %v280_v17 = vld [vmem:[%s1634_s27 + $0x18] sm:$0xff]  ;;  %v305_v18 = vld [vmem:[%s1628_s24 + $0x60] sm:$0xff] }
  0x14   : > { %v297_v19 = vld [vmem:[%s1628_s24 + $0x20] sm:$0xff]  ;;  %v290_v21 = vld [vmem:[%s1634_s27 + $0x68] sm:$0xff]  ;;  %v307_v25 = vld [vmem:[%s1628_s24 + $0x70] sm:$0xff] }
  0x15   : > { %v289_v20 = vld [vmem:[%s1634_s27 + $0x60] sm:$0xff]  ;;  %v282_v22 = vld [vmem:[%s1634_s27 + $0x28] sm:$0xff]  ;;  %v308_v26 = vld [vmem:[%s1628_s24 + $0x78] sm:$0xff] }
  0x16   : > { %v298_v23 = vld [vmem:[%s1628_s24 + $0x28] sm:$0xff]  ;;  %v281_v24 = vld [vmem:[%s1634_s27 + $0x20] sm:$0xff]  ;;  %v291_v27 = vld [vmem:[%s1634_s27 + $0x70] sm:$0xff] }
  0x17   : > { %357 = vperm.xlu0 %1471, %v302_v4   ;;  %v292_v28 = vld [vmem:[%s1634_s27 + $0x78] sm:$0xff]  ;;  %v299_v29 = vld [vmem:[%s1628_s24 + $0x30] sm:$0xff]  ;;  %v575_v30 = vld [vmem:[%s1669_s7 + $0x20] sm:$0xff] }
  0x18   : > { %317 = vperm.xlu2 %1473, %v294_v5   ;;  %v576_v31 = vld [vmem:[%s1669_s7 + $0x28] sm:$0xff]  ;;  %vm583_vm0 = vnez %v575_v30  ;;  %v300_v34 = vld [vmem:[%s1628_s24 + $0x38] sm:$0xff]  ;;  %v571_v37 = vld [vmem:[%s1669_s7] sm:$0xff] }
  0x19   : > { %474 = vperm.xlu1 %1472, %v286_v6   ;;  %vm584_vm1 = vnez %v576_v31  ;;  %v591_v32 = vsel %vm583_vm0, 16843009, %v1578_v0  ;;  %v572_v38 = vld [vmem:[%s1669_s7 + $0x8] sm:$0xff]  ;;  %vm579_vm2 = vnez %v571_v37 }
  0x1a   : > { %v592_v33 = vsel %vm584_vm1, 16843009, %v1578_v0  ;;  %v611_v35 = vunpack.c.0.s8 %v591_v32  ;;  %v615_v40 = vunpack.c.2.s8 %v591_v32  ;;  %vm580_vm3 = vnez %v572_v38 }
  0x1b   : > { %v612_v36 = vunpack.c.0.s8 %v592_v33  ;;  %v616_v41 = vunpack.c.2.s8 %v592_v33  ;;  %v617_v43 = vunpack.c.3.s8 %v591_v32  ;;  %v618_v44 = vunpack.c.3.s8 %v592_v33 }
  0x1c   : > { %v613_v47 = vunpack.c.1.s8 %v591_v32  ;;  %v614_v48 = vunpack.c.1.s8 %v592_v33  ;;  %v1684_v49 = vsel %vm579_vm2, 16843009, %v1578_v0  ;;  %v1687_v50 = vsel %vm580_vm3, 16843009, %v1578_v0 }
  0x1d   : > { %v643_v39 = vpack.c.b16 %v612_v36, %v611_v35  ;;  %v1679_v42 = vpack.c.b16 %v616_v41, %v615_v40  ;;  %v1689_v51 = vpack.c.b16 %v618_v44, %v617_v43  ;;  %v597_v54 = vunpack.c.1.s8 %v1684_v49 }
  0x1e   : > { %v645_v53 = vpack.c.b16 %v614_v48, %v613_v47  ;;  %v598_v55 = vunpack.c.1.s8 %v1687_v50  ;;  %v595_v56 = vunpack.c.0.s8 %v1684_v49  ;;  %v596_v57 = vunpack.c.0.s8 %v1687_v50 }
  0x1f   : > { %429 = vperm.xlu0 %1471, %v277_v8   ;;  %v644_v46 = vpack.c.b8 %v643_v39, %v643_v39  ;;  %v599_v35 = vunpack.c.2.s8 %v1684_v49  ;;  %v600_v36 = vunpack.c.2.s8 %v1687_v50 }
  0x20   : > { %362 = vperm.xlu2 %1473, %v303_v7   ;;  %v646_v61 = vpack.c.b8 %v645_v53, %v645_v53  ;;  %v629_v62 = vpack.c.b16 %v598_v55, %v597_v54  ;;  %v627_v63 = vpack.c.b16 %v596_v57, %v595_v56  ;;  %v577_v55 = vld [vmem:[%s1669_s7 + $0x30] sm:$0xff]  ;;  %v578_v56 = vld [vmem:[%s1669_s7 + $0x38] sm:$0xff] }
  0x21   : > { %434 = vperm.xlu1 %1472, %v278_v9   ;;  %vm667_vm4 = vnez %v644_v46  ;;  %vm585_vm0 = vnez %v577_v55  ;;  %vm586_vm1 = vnez %v578_v56 }
  0x22   : > { %v683_v60 = vsel %vm667_vm4, 16843009, %v1578_v0  ;;  %vm668_vm5 = vnez %v646_v61  ;;  %v630_v8 = vpack.c.b8 %v629_v62, %v629_v62  ;;  %v631_v61 = vpack.c.b16 %v600_v36, %v599_v35  ;;  %v573_v36 = vld [vmem:[%s1669_s7 + $0x10] sm:$0xff] }
  0x23   : > { %v707_v3 = vunpack.c.0.s8 %v683_v60  ;;  %v708_v4 = vunpack.c.1.s8 %v683_v60 }
  0x24   : > { %vm660_vm8 = vnez %v630_v8 }
  0x25   : > { %vm739_vm6 = vcmp.ne.s32.totalorder %v707_v3, 0  ;;  %vm740_vm7 = vcmp.ne.s32.totalorder %v708_v4, 0 }
  0x27   : > { %367 = vperm.xlu0 %1471, %v304_v11   ;;  %v628_v11 = vpack.c.b8 %v627_v63, %v627_v63 }
  0x28   : > { %484 = vperm.xlu2 %1473, %v288_v10  }
  0x29   : > { %479 = vperm.xlu1 %1472, %v287_v12   ;;  %vm659_vm9 = vnez %v628_v11  ;;  %v1769_v11 = vsel %vm585_vm0, 16843009, %v1578_v0 }
  0x2f   : > { %322 = vperm.xlu0 %1471, %v295_v14   ;;  %v684_v14 = vsel %vm668_vm5, 16843009, %v1578_v0 }
  0x30   : > { %439 = vperm.xlu2 %1473, %v279_v13  }
  0x31   : > { %327 = vperm.xlu1 %1472, %v296_v15  }
  0x37   : > { %444 = vperm.xlu0 %1471, %v280_v17  }
  0x38   : > { %377 = vperm.xlu2 %1473, %v306_v16  }
  0x39   : > { %372 = vperm.xlu1 %1472, %v305_v18  }
  0x3f   : > { %489 = vperm.xlu0 %1471, %v289_v20   ;;  %v710_v20 = vunpack.c.1.s8 %v684_v14 }
  0x40   : > { %332 = vperm.xlu2 %1473, %v297_v19   ;;  %v709_v19 = vunpack.c.0.s8 %v684_v14 }
  0x41   : > { %494 = vperm.xlu1 %1472, %v290_v21   ;;  %vm742_vm11 = vcmp.ne.s32.totalorder %v710_v20, 0 }
  0x42   : > { %vm741_vm10 = vcmp.ne.s32.totalorder %v709_v19, 0 }
  0x47   : > { %337 = vperm.xlu0 %1471, %v298_v23  }
  0x48   : > { %454 = vperm.xlu2 %1473, %v282_v22  }
  0x49   : > { %449 = vperm.xlu1 %1472, %v281_v24   ;;  %v676_v24 = vsel %vm660_vm8, 16843009, %v1578_v0 }
  0x4a   : > { %v694_v32 = vunpack.c.1.s8 %v676_v24 }
  0x4c   : > { %vm1736_vm13 = vcmp.ne.s32.totalorder %v694_v32, 0 }
  0x4f   : > { %382 = vperm.xlu0 %1471, %v307_v25  }
  0x51   : > { %387 = vperm.xlu1 %1472, %v308_v26   ;;  %v675_v26 = vsel %vm659_vm9, 16843009, %v1578_v0 }
  0x52   : > { %v691_v33 = vunpack.c.0.s8 %v675_v26 }
  0x54   : > { %vm1740_vm14 = vcmp.ne.s32.totalorder %v691_v33, 0 }
  0x59   : > { %499 = vperm.xlu1 %1472, %v291_v27  }
  0x61   : > { %504 = vperm.xlu1 %1472, %v292_v28  }
  0x69   : > { %342 = vperm.xlu1 %1472, %v299_v29   ;;  %v693_v29 = vunpack.c.0.s8 %v676_v24 }
  0x6a   : > { %v1681_v45 = vpop.permute.xlu2 %312 }
  0x6b   : > { %v395_v37 = vmul.f32 %v1698_v58, %v1681_v45  ;;  %v396_v38 = vmul.f32 %v1700_v59, %v1681_v45  ;;  %vm1732_vm12 = vcmp.ne.s32.totalorder %v693_v29, 0 }
  0x71   : > { %347 = vperm.xlu1 %1472, %v300_v34   ;;  %v692_v34 = vunpack.c.1.s8 %v675_v26 }
  0x72   : > { %v318_v1 = vpop.permute.xlu2 %317 }
  0x73   : > { %v397_v41 = vmul.f32 %v1698_v58, %v318_v1  ;;  %v398_v43 = vmul.f32 %v1700_v59, %v318_v1  ;;  %vm724_vm15 = vcmp.ne.s32.totalorder %v692_v34, 0  ;;  %v601_v1 = vunpack.c.3.s8 %v1684_v49  ;;  %v284_v34 = vld [vmem:[%s1634_s27 + $0x38] sm:$0xff] }
  0x7a   : > { %v1715_v25 = vpop.permute.xlu2 %362 }
  0x81   : > { %v353_v2 = vpop.permute.xlu0 %352 }
  0x82   : > { %v411_v5 = vmul.f32 %v1698_v58, %v353_v2  ;;  %v412_v6 = vmul.f32 %v1700_v59, %v353_v2  ;;  %v602_v2 = vunpack.c.3.s8 %v1687_v50  ;;  %v1748_v3 = vpop.permute.xlu2 %484 }
  0x83   : > { %v470_v7 = vpop.permute.xlu1 %469 }
  0x84   : > { %v523_v9 = vadd.f32 %v470_v7, %v411_v5  ;;  %v524_v10 = vadd.f32 %v470_v7, %v412_v6  ;;  %v633_v14 = vpack.c.b16 %v602_v2, %v601_v1 }
  0x86   : > { %v555_v12 = vand.u32 2147483647, %v523_v9  ;;  %v556_v13 = vand.u32 2147483647, %v524_v10  ;;  %v632_v9 = vpack.c.b8 %v631_v61, %v631_v61  ;;  %v634_v20 = vpack.c.b8 %v633_v14, %v633_v14 }
  0x88   : > { %v1706_v15 = vsel %vm739_vm6, %v555_v12, -1e+30  ;;  %v1708_v16 = vsel %vm740_vm7, %v556_v13, -1e+30  ;;  %v1772_v12 = vsel %vm586_vm1, 16843009, %v1578_v0  ;;  %vm661_vm2 = vnez %v632_v9 }
  0x89   : > { %v358_v17 = vpop.permute.xlu0 %357  ;;  %v811_v18 = vmax.f32 %v1706_v15, %v1708_v16  ;;  %v620_v19 = vunpack.c.0.s8 %v1772_v12  ;;  %vm662_vm3 = vnez %v634_v20  ;;  %vm581_vm7 = vnez %v573_v36  ;;  %v283_v20 = vld [vmem:[%s1634_s27 + $0x30] sm:$0xff] }
  0x8a   : > { %v413_v21 = vmul.f32 %v1698_v58, %v358_v17  ;;  %v414_v22 = vmul.f32 %v1700_v59, %v358_v17  ;;  %v678_v35 = vsel %vm662_vm3, 16843009, %v1578_v0  ;;  %v1806_v2 = vsel %vm581_vm7, 16843009, %v1578_v0 }
  0x8b   : > { %v475_v23 = vpop.permute.xlu1 %474  ;;  %812 = vmax.xlane.f32.xlu2 %v811_v18  ;;  %v619_v18 = vunpack.c.0.s8 %v1769_v11  ;;  %v698_v47 = vunpack.c.1.s8 %v678_v35 }
  0x8c   : > { %v525_v27 = vadd.f32 %v475_v23, %v413_v21  ;;  %v526_v28 = vadd.f32 %v475_v23, %v414_v22  ;;  %v677_v21 = vsel %vm661_vm2, 16843009, %v1578_v0  ;;  %v440_v22 = vpop.permute.xlu2 %439 }
  0x8d   : > { %v651_v23 = vpack.c.b16 %v620_v19, %v619_v18  ;;  %v695_v26 = vunpack.c.0.s8 %v677_v21 }
  0x8e   : > { %v557_v30 = vand.u32 2147483647, %v525_v27  ;;  %v558_v31 = vand.u32 2147483647, %v526_v28  ;;  %v696_v27 = vunpack.c.1.s8 %v677_v21 }
  0x8f   : > { %vm727_vm4 = vcmp.ne.s32.totalorder %v695_v26, 0 }
  0x90   : > { %v1724_v39 = vsel %vm741_vm10, %v557_v30, -1e+30  ;;  %v1726_v40 = vsel %vm742_vm11, %v558_v31, -1e+30  ;;  %v652_v31 = vpack.c.b8 %v651_v23, %v651_v23  ;;  %vm728_vm5 = vcmp.ne.s32.totalorder %v696_v27, 0 }
  0x91   : > { %v430_v44 = vpop.permute.xlu0 %429  ;;  %v814_v46 = vmax.f32 %v1724_v39, %v1726_v40  ;;  %vm730_vm10 = vcmp.ne.s32.totalorder %v698_v47, 0 }
  0x92   : > { %v507_v52 = vadd.f32 %v430_v44, %v395_v37  ;;  %v508_v53 = vadd.f32 %v430_v44, %v396_v38  ;;  %v621_v37 = vunpack.c.1.s8 %v1769_v11  ;;  %v622_v38 = vunpack.c.1.s8 %v1772_v12  ;;  %v574_v44 = vld [vmem:[%s1669_s7 + $0x18] sm:$0xff] }
  0x93   : > { %v435_v48 = vpop.permute.xlu1 %434  ;;  %815 = vmax.xlane.f32.xlu0 %v814_v46  ;;  %v697_v46 = vunpack.c.0.s8 %v678_v35  ;;  %vm1789_vm6 = vnez %v652_v31  ;;  %vm582_vm8 = vnez %v574_v44 }
  0x94   : > { %v509_v57 = vadd.f32 %v435_v48, %v397_v41  ;;  %v510_v60 = vadd.f32 %v435_v48, %v398_v43  ;;  %v539_v62 = vand.u32 2147483647, %v507_v52  ;;  %v540_v63 = vand.u32 2147483647, %v508_v53  ;;  %v378_v55 = vpop.permute.xlu2 %377 }
  0x95   : > { %vm729_vm9 = vcmp.ne.s32.totalorder %v697_v46, 0  ;;  %v687_v1 = vsel %vm1789_vm6, 16843009, %v1578_v0  ;;  %v422_v35 = vmul.f32 %v1700_v59, %v378_v55 }
  0x96   : > { %v541_v4 = vand.u32 2147483647, %v509_v57  ;;  %v542_v5 = vand.u32 2147483647, %v510_v60  ;;  %v1752_v6 = vsel %vm1740_vm14, %v539_v62, -1e+30  ;;  %v653_v60 = vpack.c.b16 %v622_v38, %v621_v37 }
  0x97   : > { %v1754_v7 = vsel %vm724_vm15, %v540_v63, -1e+30  ;;  %v715_v21 = vunpack.c.0.s8 %v687_v1 }
  0x98   : > { %v1758_v8 = vsel %vm1732_vm12, %v541_v4, -1e+30  ;;  %v1762_v49 = vsel %vm1736_vm13, %v542_v5, -1e+30  ;;  %v787_v50 = vmax.f32 %v1752_v6, %v1754_v7  ;;  %v654_v9 = vpack.c.b8 %v653_v60, %v653_v60 }
  0x99   : > { %v790_v10 = vmax.f32 %v1758_v8, %v1762_v49  ;;  %v1774_v13 = vpop.permute.xlu0 %367  ;;  %vm747_vm12 = vcmp.ne.s32.totalorder %v715_v21, 0 }
  0x9a   : > { %vm672_vm11 = vnez %v654_v9 }
  0x9b   : > { %791 = vmax.xlane.f32.xlu2 %v790_v10  ;;  %v1776_v17 = vpop.permute.xlu1 %479  ;;  %788 = vmax.xlane.f32.xlu1 %v787_v50  ;;  %v1809_v50 = vsel %vm582_vm8, 16843009, %v1578_v0  ;;  %v605_v10 = vunpack.c.1.s8 %v1806_v2  ;;  %v688_v38 = vsel %vm672_vm11, 16843009, %v1578_v0 }
  0x9c   : > { %v606_v14 = vunpack.c.1.s8 %v1809_v50  ;;  %v717_v48 = vunpack.c.0.s8 %v688_v38 }
  0x9e   : > { %vm749_vm0 = vcmp.ne.s32.totalorder %v717_v48, 0  ;;  %v624_v48 = vunpack.c.2.s8 %v1772_v12 }
  0xa1   : > { %v323_v24 = vpop.permute.xlu0 %322 }
  0xa2   : > { %v399_v29 = vmul.f32 %v1698_v58, %v323_v24  ;;  %v400_v30 = vmul.f32 %v1700_v59, %v323_v24 }
  0xa3   : > { %v328_v28 = vpop.permute.xlu1 %327 }
  0xa4   : > { %v511_v32 = vadd.f32 %v440_v22, %v399_v29  ;;  %v512_v33 = vadd.f32 %v440_v22, %v400_v30  ;;  %v401_v52 = vmul.f32 %v1698_v58, %v328_v28  ;;  %v402_v53 = vmul.f32 %v1700_v59, %v328_v28 }
  0xa5   : > { %v716_v22 = vunpack.c.1.s8 %v687_v1  ;;  %v637_v28 = vpack.c.b16 %v606_v14, %v605_v10 }
  0xa6   : > { %v543_v41 = vand.u32 2147483647, %v511_v32  ;;  %v544_v43 = vand.u32 2147483647, %v512_v33  ;;  %v421_v32 = vmul.f32 %v1698_v58, %v378_v55  ;;  %v1823_v33 = vpop.permute.xlu2 %332 }
  0xa7   : > { %464 = vperm.xlu0 %1471, %v284_v34   ;;  %vm748_vm13 = vcmp.ne.s32.totalorder %v716_v22, 0  ;;  %v648_v34 = vpack.c.b8 %v1679_v42, %v1679_v42 }
  0xa8   : > { %v1795_v45 = vsel %vm727_vm4, %v543_v41, -1e+30  ;;  %v1797_v54 = vsel %vm728_vm5, %v544_v43, -1e+30  ;;  %v638_v41 = vpack.c.b8 %v637_v28, %v637_v28 }
  0xa9   : > { %v445_v56 = vpop.permute.xlu0 %444  ;;  %v793_v57 = vmax.f32 %v1795_v45, %v1797_v54  ;;  %vm1833_vm14 = vnez %v648_v34 }
  0xaa   : > { %v513_v62 = vadd.f32 %v445_v56, %v401_v52  ;;  %v514_v63 = vadd.f32 %v445_v56, %v402_v53  ;;  %v718_v52 = vunpack.c.1.s8 %v688_v38  ;;  %vm664_vm15 = vnez %v638_v41  ;;  %v1437_v38 = vld [vmem:[%s2125_s4 + $0x38] sm:$0xff]  ;;  %v1444_v53 = vld [vmem:[%s2125_s4 + $0x70] sm:$0xff] }
  0xab   : > { %v373_v61 = vpop.permute.xlu1 %372  ;;  %794 = vmax.xlane.f32.xlu1 %v793_v57  ;;  %v603_v56 = vunpack.c.0.s8 %v1806_v2  ;;  %v604_v57 = vunpack.c.0.s8 %v1809_v50  ;;  %v685_v9 = vsel %vm1833_vm14, 16843009, %v1578_v0  ;;  %1446 = vmatpush.bf16.msra.mxu2 %v1437_v38 }
  0xac   : > { %v545_v4 = vand.u32 2147483647, %v513_v62  ;;  %v546_v5 = vand.u32 2147483647, %v514_v63  ;;  %v419_v23 = vmul.f32 %v1698_v58, %v373_v61  ;;  %v420_v24 = vmul.f32 %v1700_v59, %v373_v61  ;;  %1123 = vmatpush.bf16.msra.mxu0 %v1437_v38 }
  0xad   : > { %vm750_vm1 = vcmp.ne.s32.totalorder %v718_v52, 0  ;;  %v635_v10 = vpack.c.b16 %v604_v57, %v603_v56  ;;  %v1436_v52 = vld [vmem:[%s2125_s4 + $0x30] sm:$0xff]  ;;  %v403_v57 = vmul.f32 %v1698_v58, %v1823_v33 }
  0xae   : > { %v1813_v18 = vsel %vm729_vm9, %v545_v4, -1e+30  ;;  %v1815_v19 = vsel %vm730_vm10, %v546_v5, -1e+30  ;;  %v680_v4 = vsel %vm664_vm15, 16843009, %v1578_v0  ;;  %v455_v5 = vpop.permute.xlu2 %454 }
  0xaf   : > { %v796_v27 = vmax.f32 %v1813_v18, %v1815_v19  ;;  %1447 = vmatpush.bf16.msra.mxu2 %v1436_v52 }
  0xb0   : > { %1124 = vmatpush.bf16.msra.mxu0 %v1436_v52 }
  0xb1   : > { %v490_v26 = vpop.permute.xlu0 %489 }
  0xb2   : > { %v531_v30 = vadd.f32 %v490_v26, %v419_v23  ;;  %v532_v31 = vadd.f32 %v490_v26, %v420_v24  ;;  %v701_v23 = vunpack.c.0.s8 %v680_v4  ;;  %v702_v24 = vunpack.c.1.s8 %v680_v4 }
  0xb3   : > { %459 = vperm.xlu2 %1473, %v283_v20   ;;  %v495_v29 = vpop.permute.xlu1 %494  ;;  %797 = vmax.xlane.f32.xlu1 %v796_v27  ;;  %v415_v26 = vmul.f32 %v1698_v58, %v1715_v25  ;;  %v416_v27 = vmul.f32 %v1700_v59, %v1715_v25  ;;  %v626_v25 = vunpack.c.3.s8 %v1772_v12  ;;  %v417_v4 = vmul.f32 %v1698_v58, %v1774_v13 }
  0xb4   : > { %v563_v36 = vand.u32 2147483647, %v531_v30  ;;  %v564_v37 = vand.u32 2147483647, %v532_v31  ;;  %v533_v43 = vadd.f32 %v495_v29, %v421_v32  ;;  %v534_v44 = vadd.f32 %v495_v29, %v422_v35 }
  0xb5   : > { %v711_v29 = vunpack.c.0.s8 %v685_v9  ;;  %v650_v30 = vpack.c.b8 %v1689_v51, %v1689_v51  ;;  %v527_v31 = vadd.f32 %v1776_v17, %v415_v26  ;;  %vm733_vm2 = vcmp.ne.s32.totalorder %v701_v23, 0  ;;  %v1445_v51 = vld [vmem:[%s2125_s4 + $0x78] sm:$0xff] }
  0xb6   : > { %v1829_v46 = vsel %vm747_vm12, %v563_v36, -1e+30  ;;  %v1831_v47 = vsel %vm748_vm13, %v564_v37, -1e+30  ;;  %v565_v60 = vand.u32 2147483647, %v533_v43  ;;  %v636_v36 = vpack.c.b8 %v635_v10, %v635_v10  ;;  %1454 = vmatpush.bf16.msra.mxu3 %v1445_v51  ;;  %1172 = vmatpush.bf16.msra.mxu1 %v1445_v51 }
  0xb7   : > { %v823_v55 = vmax.f32 %v1829_v46, %v1831_v47  ;;  %v566_v61 = vand.u32 2147483647, %v534_v44  ;;  %vm734_vm3 = vcmp.ne.s32.totalorder %v702_v24, 0  ;;  %v625_v37 = vunpack.c.3.s8 %v1769_v11  ;;  %v1435_v10 = vld [vmem:[%s2125_s4 + $0x28] sm:$0xff] }
  0xb8   : > { %v1849_v21 = vsel %vm749_vm0, %v565_v60, -1e+30  ;;  %v528_v41 = vadd.f32 %v1776_v17, %v416_v27  ;;  %v712_v43 = vunpack.c.1.s8 %v685_v9  ;;  %v623_v44 = vunpack.c.2.s8 %v1769_v11  ;;  %1448 = vmatpush.bf16.msra.mxu2 %v1435_v10  ;;  %1125 = vmatpush.bf16.msra.mxu0 %v1435_v10 }
  0xb9   : > { %v338_v42 = vpop.permute.xlu0 %337  ;;  %v1851_v22 = vsel %vm750_vm1, %v566_v61, -1e+30  ;;  %vm663_vm4 = vnez %v636_v36  ;;  %v559_v11 = vand.u32 2147483647, %v527_v31  ;;  %vm1885_vm5 = vcmp.ne.s32.totalorder %v711_v29, 0 }
  0xba   : > { %v405_v63 = vmul.f32 %v1698_v58, %v338_v42  ;;  %v406_v1 = vmul.f32 %v1700_v59, %v338_v42  ;;  %v826_v28 = vmax.f32 %v1849_v21, %v1851_v22  ;;  %vm1889_vm6 = vnez %v650_v30  ;;  %1455 = vmatpush.bf16.msra.mxu3 %v1444_v53 }
  0xbb   : > { %v1841_v62 = vpop.permute.xlu1 %449  ;;  %824 = vmax.xlane.f32.xlu1 %v823_v55  ;;  %v657_v56 = vpack.c.b16 %v626_v25, %v625_v37  ;;  %v560_v60 = vand.u32 2147483647, %v528_v41  ;;  %vm1895_vm7 = vcmp.ne.s32.totalorder %v712_v43, 0  ;;  %v679_v9 = vsel %vm663_vm4, 16843009, %v1578_v0  ;;  %1173 = vmatpush.bf16.msra.mxu1 %v1444_v53  ;;  %v1440_v43 = vld [vmem:[%s2125_s4 + $0x50] sm:$0xff] }
  0xbc   : > { %v517_v14 = vadd.f32 %v455_v5, %v405_v63  ;;  %v518_v20 = vadd.f32 %v455_v5, %v406_v1  ;;  %v655_v63 = vpack.c.b16 %v624_v48, %v623_v44  ;;  %v404_v1 = vmul.f32 %v1700_v59, %v1823_v33 }
  0xbd   : > { %v418_v33 = vmul.f32 %v1700_v59, %v1774_v13  ;;  %v686_v23 = vsel %vm1889_vm6, 16843009, %v1578_v0  ;;  %v515_v24 = vadd.f32 %v1841_v62, %v403_v57  ;;  %v1921_v27 = vsel %vm1885_vm5, %v559_v11, -1e+30 }
  0xbe   : > { %v549_v32 = vand.u32 2147483647, %v517_v14  ;;  %v550_v34 = vand.u32 2147483647, %v518_v20  ;;  %v1443_v14 = vld [vmem:[%s2125_s4 + $0x68] sm:$0xff]  ;;  %v516_v26 = vadd.f32 %v1841_v62, %v404_v1  ;;  %v699_v29 = vunpack.c.0.s8 %v679_v9 }
  0xbf   : > { %v1925_v13 = vsel %vm1895_vm7, %v560_v60, -1e+30  ;;  %v700_v30 = vunpack.c.1.s8 %v679_v9  ;;  %v656_v31 = vpack.c.b8 %v655_v63, %v655_v63  ;;  %v714_v36 = vunpack.c.1.s8 %v686_v23  ;;  %1456 = vmatpush.bf16.msra.mxu3 %v1443_v14  ;;  %1174 = vmatpush.bf16.msra.mxu1 %v1443_v14 }
  0xc0   : > { %v1881_v42 = vsel %vm733_vm2, %v549_v32, -1e+30  ;;  %v1883_v55 = vsel %vm734_vm3, %v550_v34, -1e+30  ;;  %v529_v32 = vadd.f32 %v1748_v3, %v417_v4  ;;  %v713_v34 = vunpack.c.0.s8 %v686_v23 }
  0xc1   : > { %v802_v5 = vmax.f32 %v1881_v42, %v1883_v55  ;;  %v530_v62 = vadd.f32 %v1748_v3, %v418_v33  ;;  %v547_v37 = vand.u32 2147483647, %v515_v24  ;;  %v548_v25 = vand.u32 2147483647, %v516_v26  ;;  %v383_v41 = vpop.permute.xlu0 %382  ;;  %v1431_v3 = vld [vmem:[%s2125_s4 + $0x8] sm:$0xff] }
  0xc2   : > { %v817_v38 = vmax.f32 %v1921_v27, %v1925_v13  ;;  %vm731_vm9 = vcmp.ne.s32.totalorder %v699_v29, 0  ;;  %vm732_vm10 = vcmp.ne.s32.totalorder %v700_v30, 0  ;;  %vm673_vm11 = vnez %v656_v31 }
  0xc3   : > { %v1862_v35 = vpop.permute.xlu1 %387  ;;  %827 = vmax.xlane.f32.xlu1 %v826_v28  ;;  %v658_v28 = vpack.c.b8 %v657_v56, %v657_v56  ;;  %v561_v51 = vand.u32 2147483647, %v529_v32  ;;  %vm1931_vm12 = vcmp.ne.s32.totalorder %v713_v34, 0  ;;  %vm1935_vm13 = vcmp.ne.s32.totalorder %v714_v36, 0 }
  0xc4   : > { %v562_v44 = vand.u32 2147483647, %v530_v62  ;;  %v425_v48 = vmul.f32 %v1698_v58, %v1862_v35  ;;  %v426_v52 = vmul.f32 %v1700_v59, %v1862_v35  ;;  %v1944_v12 = vsel %vm731_vm9, %v547_v37, -1e+30  ;;  %v1434_v37 = vld [vmem:[%s2125_s4 + $0x20] sm:$0xff] }
  0xc5   : > { %vm674_vm8 = vnez %v658_v28  ;;  %v1946_v17 = vsel %vm732_vm10, %v548_v25, -1e+30  ;;  %v689_v56 = vsel %vm673_vm11, 16843009, %v1578_v0  ;;  %v423_v57 = vmul.f32 %v1698_v58, %v383_v41  ;;  %v1442_v25 = vld [vmem:[%s2125_s4 + $0x60] sm:$0xff]  ;;  %1449 = vmatpush.bf16.msra.mxu2 %v1434_v37  ;;  %1126 = vmatpush.bf16.msra.mxu0 %v1434_v37 }
  0xc6   : > { %v690_v11 = vsel %vm674_vm8, 16843009, %v1578_v0  ;;  %v424_v60 = vmul.f32 %v1700_v59, %v383_v41  ;;  %v1953_v35 = vsel %vm1931_vm12, %v561_v51, -1e+30  ;;  %v1957_v10 = vsel %vm1935_vm13, %v562_v44, -1e+30  ;;  %1457 = vmatpush.bf16.msra.mxu3 %v1442_v25  ;;  %1175 = vmatpush.bf16.msra.mxu1 %v1442_v25 }
  0xc7   : > { %v721_v1 = vunpack.c.0.s8 %v690_v11  ;;  %v722_v4 = vunpack.c.1.s8 %v690_v11  ;;  %v799_v14 = vmax.f32 %v1944_v12, %v1946_v17  ;;  %v719_v33 = vunpack.c.0.s8 %v689_v56  ;;  %v1441_v51 = vld [vmem:[%s2125_s4 + $0x58] sm:$0xff]  ;;  %v1432_v41 = vld [vmem:[%s2125_s4 + $0x10] sm:$0xff]  ;;  %v1439_v44 = vld [vmem:[%s2125_s4 + $0x48] sm:$0xff] }
  0xc8   : > { %v720_v23 = vunpack.c.1.s8 %v689_v56  ;;  %v820_v28 = vmax.f32 %v1953_v35, %v1957_v10 }
  0xc9   : > { %vm753_vm14 = vcmp.ne.s32.totalorder %v721_v1, 0  ;;  %vm754_vm15 = vcmp.ne.s32.totalorder %v722_v4, 0  ;;  %vm751_vm0 = vcmp.ne.s32.totalorder %v719_v33, 0 }
  0xca   : > { %vm752_vm1 = vcmp.ne.s32.totalorder %v720_v23, 0  ;;  %1458 = vmatpush.bf16.msra.mxu3 %v1441_v51  ;;  %1176 = vmatpush.bf16.msra.mxu1 %v1441_v51 }
  0xcb   : > { %v500_v20 = vpop.permute.xlu1 %499  ;;  %803 = vmax.xlane.f32.xlu1 %v802_v5 }
  0xcc   : > { %v535_v5 = vadd.f32 %v500_v20, %v423_v57  ;;  %v536_v9 = vadd.f32 %v500_v20, %v424_v60  ;;  %v607_v60 = vunpack.c.2.s8 %v1806_v2 }
  0xce   : > { %v567_v20 = vand.u32 2147483647, %v535_v5  ;;  %v568_v29 = vand.u32 2147483647, %v536_v9  ;;  %1459 = vmatpush.bf16.msra.mxu3 %v1440_v43  ;;  %1177 = vmatpush.bf16.msra.mxu1 %v1440_v43  ;;  %v609_v9 = vunpack.c.3.s8 %v1806_v2 }
  0xd0   : > { %v1967_v32 = vsel %vm751_vm0, %v567_v20, -1e+30  ;;  %v1969_v34 = vsel %vm752_vm1, %v568_v29, -1e+30 }
  0xd1   : > { %818 = vmax.xlane.f32.xlu0 %v817_v38  ;;  %v829_v62 = vmax.f32 %v1967_v32, %v1969_v34  ;;  %v1433_v38 = vld [vmem:[%s2125_s4 + $0x18] sm:$0xff] }
  0xd2   : > { %1450 = vmatpush.bf16.msra.mxu2 %v1433_v38  ;;  %1127 = vmatpush.bf16.msra.mxu0 %v1433_v38 }
  0xd3   : > { %v505_v53 = vpop.permute.xlu1 %504  ;;  %1460 = vmatpush.bf16.msra.mxu3 %v1439_v44  ;;  %1178 = vmatpush.bf16.msra.mxu1 %v1439_v44 }
  0xd4   : > { %v537_v61 = vadd.f32 %v505_v53, %v425_v48  ;;  %v538_v63 = vadd.f32 %v505_v53, %v426_v52  ;;  %v1430_v48 = vld [vmem:[%s2125_s4] sm:$0xff] }
  0xd5   : > { %v1438_v52 = vld [vmem:[%s2125_s4 + $0x40] sm:$0xff] }
  0xd6   : > { %v569_v24 = vand.u32 2147483647, %v537_v61  ;;  %v570_v26 = vand.u32 2147483647, %v538_v63  ;;  %1451 = vmatpush.bf16.msra.mxu2 %v1432_v41  ;;  %1128 = vmatpush.bf16.msra.mxu0 %v1432_v41  ;;  %v608_v61 = vunpack.c.2.s8 %v1809_v50 }
  0xd7   : > { %1461 = vmatpush.bf16.msra.mxu3 %v1438_v52  ;;  %1179 = vmatpush.bf16.msra.mxu1 %v1438_v52 }
  0xd8   : > { %v1963_v30 = vsel %vm753_vm14, %v569_v24, -1e+30  ;;  %v1965_v31 = vsel %vm754_vm15, %v570_v26, -1e+30  ;;  %v639_v4 = vpack.c.b16 %v608_v61, %v607_v60 }
  0xd9   : > { %800 = vmax.xlane.f32.xlu0 %v799_v14  ;;  %v832_v36 = vmax.f32 %v1963_v30, %v1965_v31  ;;  %v610_v14 = vunpack.c.3.s8 %v1809_v50 }
  0xda   : > { %1452 = vmatpush.bf16.msra.mxu2 %v1431_v3  ;;  %1129 = vmatpush.bf16.msra.mxu0 %v1431_v3 }
  0xdb   : > { %v343_v53 = vpop.permute.xlu1 %342  ;;  %v641_v20 = vpack.c.b16 %v610_v14, %v609_v9 }
  0xdc   : > { %821 = vmax.xlane.f32.xlu2 %v820_v28 }
  0xdd   : > { %v642_v37 = vpack.c.b8 %v641_v20, %v641_v20 }
  0xde   : > { %1453 = vmatpush.bf16.msra.mxu2 %v1430_v48  ;;  %1130 = vmatpush.bf16.msra.mxu0 %v1430_v48 }
  0xdf   : > { %vm666_vm3 = vnez %v642_v37 }
  0xe1   : > { %833 = vmax.xlane.f32.xlu0 %v832_v36 }
  0xe3   : > { %v348_v5 = vpop.permute.xlu1 %347 }
  0xe4   : > { %830 = vmax.xlane.f32.xlu2 %v829_v62  ;;  %v409_v14 = vmul.f32 %v1698_v58, %v348_v5 }
  0xfe   : > { %v813_v11 = vpop.xlane.xlu2 %812 }
  0xff   : > { %v851_v56 = vsub.f32 %v1706_v15, %v813_v11  ;;  %v852_v57 = vsub.f32 %v1708_v16, %v813_v11  ;;  %v640_v16 = vpack.c.b8 %v639_v4, %v639_v4 }
 0x101   : > { %v899_v63 = vmul.f32 1.442695, %v851_v56  ;;  %v901_v1 = vmul.f32 1.442695, %v852_v57  ;;  %vm665_vm2 = vnez %v640_v16  ;;  %v682_v57 = vsel %vm666_vm3, 16843009, %v1578_v0 }
 0x102   : > { %v681_v38 = vsel %vm665_vm2, 16843009, %v1578_v0  ;;  %v706_v4 = vunpack.c.1.s8 %v682_v57 }
 0x103   : > { %1474 = vpow2.f32 %v899_v63  ;;  %v703_v11 = vunpack.c.0.s8 %v681_v38  ;;  %v704_v56 = vunpack.c.1.s8 %v681_v38 }
 0x104   : > { %1476 = vpow2.f32 %v901_v1  ;;  %v705_v1 = vunpack.c.0.s8 %v682_v57  ;;  %vm738_vm7 = vcmp.ne.s32.totalorder %v706_v4, 0 }
 0x105   : > { %vm735_vm4 = vcmp.ne.s32.totalorder %v703_v11, 0  ;;  %vm736_vm5 = vcmp.ne.s32.totalorder %v704_v56, 0 }
 0x106   : > { %v816_v33 = vpop.xlane.xlu0 %815  ;;  %vm737_vm6 = vcmp.ne.s32.totalorder %v705_v1, 0 }
 0x107   : > { %v853_v23 = vsub.f32 %v1724_v39, %v816_v33  ;;  %v854_v15 = vsub.f32 %v1726_v40, %v816_v33  ;;  %v410_v33 = vmul.f32 %v1700_v59, %v348_v5 }
 0x109   : > { %v1475_v24 = vpop.eup %1474  ;;  %v903_v26 = vmul.f32 1.442695, %v853_v23  ;;  %v905_v28 = vmul.f32 1.442695, %v854_v15 }
 0x10a   : > { %v1477_v29 = vpop.eup %1476 }
 0x10b   : > { %1478 = vpow2.f32 %v903_v26  ;;  %v2013_v36 = vadd.f32 %v1477_v29, %v1475_v24 }
 0x10c   : > { %1480 = vpow2.f32 %v905_v28 }
 0x10e   : > { %v792_v62 = vpop.xlane.xlu2 %791  ;;  %v789_v2 = vpop.xlane.xlu1 %788 }
 0x10f   : > { %v837_v50 = vsub.f32 %v1758_v8, %v792_v62  ;;  %v838_v39 = vsub.f32 %v1762_v49, %v792_v62  ;;  %v835_v40 = vsub.f32 %v1752_v6, %v789_v2  ;;  %v836_v25 = vsub.f32 %v1754_v7, %v789_v2 }
 0x110   : > { %v407_v6 = vmul.f32 %v1698_v58, %v343_v53  ;;  %v408_v7 = vmul.f32 %v1700_v59, %v343_v53 }
 0x111   : > { %v871_v51 = vmul.f32 1.442695, %v837_v50  ;;  %v873_v41 = vmul.f32 1.442695, %v838_v39  ;;  %v867_v43 = vmul.f32 1.442695, %v835_v40  ;;  %v1479_v3 = vpop.eup %1478 }
 0x112   : > { %v869_v44 = vmul.f32 1.442695, %v836_v25  ;;  %v1481_v48 = vpop.eup %1480  ;;  %v987_v52 = vpack.c.bf16 %v1479_v3, %v1475_v24 }
 0x113   : > { %1482 = vpow2.f32 %v871_v51  ;;  %v988_v8 = vpack.c.bf16 %v1481_v48, %v1477_v29  ;;  %v2020_v49 = vadd.f32 %v1481_v48, %v1479_v3 }
 0x114   : > { %1484 = vpow2.f32 %v873_v41  ;;  %1151 = vmatmul.bf16.vlgmr.msra.gmra.mxu2 %v987_v52 }
 0x115   : > { %1486 = vpow2.f32 %v867_v43  ;;  %1200 = vmatmul.bf16.vlgmr.msra.gmra.mxu3 %v988_v8 }
 0x116   : > { %1488 = vpow2.f32 %v869_v44  ;;  %v460_v60 = vpop.permute.xlu2 %459 }
 0x117   : > { %v519_v61 = vadd.f32 %v460_v60, %v407_v6  ;;  %v520_v63 = vadd.f32 %v460_v60, %v408_v7 }
 0x119   : > { %v1483_v9 = vpop.eup %1482  ;;  %v551_v23 = vand.u32 2147483647, %v519_v61  ;;  %v552_v53 = vand.u32 2147483647, %v520_v63  ;;  %v465_v16 = vpop.permute.xlu0 %464 }
 0x11a   : > { %v1485_v15 = vpop.eup %1484  ;;  %v521_v0 = vadd.f32 %v465_v16, %v409_v14  ;;  %v522_v26 = vadd.f32 %v465_v16, %v410_v33 }
 0x11b   : > { %v1487_v24 = vpop.eup %1486  ;;  %v2027_v28 = vsel %vm735_vm4, %v551_v23, -1e+30  ;;  %v2029_v20 = vsel %vm736_vm5, %v552_v53, -1e+30  ;;  %v934_v3 = vadd.f32 %v1485_v15, %v1483_v9 }
 0x11c   : > { %v1489_v29 = vpop.eup %1488  ;;  %v979_v62 = vpack.c.bf16 %v1483_v9, %v1487_v24  ;;  %v805_v2 = vmax.f32 %v2027_v28, %v2029_v20  ;;  %v553_v58 = vand.u32 2147483647, %v521_v0  ;;  %v554_v59 = vand.u32 2147483647, %v522_v26 }
 0x11d   : > { %v980_v5 = vpack.c.bf16 %v1485_v15, %v1489_v29  ;;  %v931_v37 = vadd.f32 %v1489_v29, %v1487_v24 }
 0x11e   : > { %1131 = vmatmul.bf16.vlgmr.msra.gmra.mxu0 %v979_v62  ;;  %806 = vmax.xlane.f32.xlu1 %v805_v2  ;;  %v795_v50 = vpop.xlane.xlu1 %794  ;;  %v2033_v39 = vsel %vm737_vm6, %v553_v58, -1e+30  ;;  %v2035_v40 = vsel %vm738_vm7, %v554_v59, -1e+30 }
 0x11f   : > { %1180 = vmatmul.bf16.vlgmr.msra.gmra.mxu1 %v980_v5  ;;  %932 = vadd.xlane.f32.xlu0 %v931_v37  ;;  %v839_v25 = vsub.f32 %v1795_v45, %v795_v50  ;;  %v840_v38 = vsub.f32 %v1797_v54, %v795_v50  ;;  %v808_v51 = vmax.f32 %v2033_v39, %v2035_v40 }
 0x121   : > { %v875_v41 = vmul.f32 1.442695, %v839_v25  ;;  %v877_v43 = vmul.f32 1.442695, %v840_v38  ;;  %809 = vmax.xlane.f32.xlu2 %v808_v51 }
 0x123   : > { %1490 = vpow2.f32 %v875_v41 }
 0x124   : > { %1492 = vpow2.f32 %v877_v43 }
 0x126   : > { %935 = vadd.xlane.f32.xlu1 %v934_v3  ;;  %v798_v44 = vpop.xlane.xlu1 %797 }
 0x127   : > { %v841_v48 = vsub.f32 %v1813_v18, %v798_v44  ;;  %v842_v52 = vsub.f32 %v1815_v19, %v798_v44 }
 0x129   : > { %v1491_v11 = vpop.eup %1490  ;;  %v879_v8 = vmul.f32 1.442695, %v841_v48  ;;  %v881_v45 = vmul.f32 1.442695, %v842_v52 }
 0x12a   : > { %v1493_v56 = vpop.eup %1492 }
 0x12b   : > { %1494 = vpow2.f32 %v879_v8  ;;  %v937_v54 = vadd.f32 %v1493_v56, %v1491_v11 }
 0x12c   : > { %1496 = vpow2.f32 %v881_v45 }
 0x12d   : > { %938 = vadd.xlane.f32.xlu2 %v937_v54 }
 0x12e   : > { %v825_v6 = vpop.xlane.xlu1 %824 }
 0x12f   : > { %v859_v7 = vsub.f32 %v1829_v46, %v825_v6  ;;  %v860_v57 = vsub.f32 %v1831_v47, %v825_v6 }
 0x131   : > { %v1495_v60 = vpop.eup %1494  ;;  %v915_v61 = vmul.f32 1.442695, %v859_v7  ;;  %v917_v63 = vmul.f32 1.442695, %v860_v57 }
 0x132   : > { %v1497_v1 = vpop.eup %1496  ;;  %v981_v18 = vpack.c.bf16 %v1495_v60, %v1491_v11 }
 0x133   : > { %1498 = vpow2.f32 %v915_v61  ;;  %v982_v19 = vpack.c.bf16 %v1497_v1, %v1493_v56  ;;  %v940_v4 = vadd.f32 %v1497_v1, %v1495_v60 }
 0x134   : > { %1500 = vpow2.f32 %v917_v63  ;;  %1136 = vmatmul.bf16.gmra.mxu0 %v981_v18 }
 0x135   : > { %1185 = vmatmul.bf16.gmra.mxu1 %v982_v19  ;;  %941 = vadd.xlane.f32.xlu0 %v940_v4 }
 0x136   : > { %v828_v9 = vpop.xlane.xlu1 %827 }
 0x137   : > { %v861_v14 = vsub.f32 %v1849_v21, %v828_v9  ;;  %v862_v33 = vsub.f32 %v1851_v22, %v828_v9 }
 0x139   : > { %v2047_v46 = vpop.eup %1498  ;;  %v919_v47 = vmul.f32 1.442695, %v861_v14  ;;  %v921_v23 = vmul.f32 1.442695, %v862_v33 }
 0x13a   : > { %v2049_v53 = vpop.eup %1500 }
 0x13b   : > { %1502 = vpow2.f32 %v919_v47  ;;  %v2053_v15 = vadd.f32 %v2049_v53, %v2047_v46 }
 0x13c   : > { %1504 = vpow2.f32 %v921_v23 }
 0x13e   : > { %v804_v16 = vpop.xlane.xlu1 %803 }
 0x13f   : > { %v845_v24 = vsub.f32 %v1881_v42, %v804_v16  ;;  %v846_v0 = vsub.f32 %v1883_v55, %v804_v16 }
 0x141   : > { %v2057_v21 = vpop.eup %1502  ;;  %v887_v22 = vmul.f32 1.442695, %v845_v24  ;;  %v889_v26 = vmul.f32 1.442695, %v846_v0 }
 0x142   : > { %v2059_v29 = vpop.eup %1504  ;;  %v991_v23 = vpack.c.bf16 %v2057_v21, %v2047_v46 }
 0x143   : > { %1506 = vpow2.f32 %v887_v22  ;;  %v2063_v62 = vadd.f32 %v2059_v29, %v2057_v21  ;;  %v992_v16 = vpack.c.bf16 %v2059_v29, %v2049_v53 }
 0x144   : > { %1508 = vpow2.f32 %v889_v26  ;;  %v819_v2 = vpop.xlane.xlu0 %818 }
 0x145   : > { %v855_v58 = vsub.f32 %v1921_v27, %v819_v2  ;;  %v856_v59 = vsub.f32 %v1925_v13, %v819_v2 }
 0x147   : > { %v907_v42 = vmul.f32 1.442695, %v855_v58  ;;  %v909_v5 = vmul.f32 1.442695, %v856_v59 }
 0x149   : > { %v1507_v55 = vpop.eup %1506  ;;  %1510 = vpow2.f32 %v907_v42 }
 0x14a   : > { %v1509_v37 = vpop.eup %1508  ;;  %1512 = vpow2.f32 %v909_v5 }
 0x14b   : > { %v946_v50 = vadd.f32 %v1509_v37, %v1507_v55 }
 0x14c   : > { %v801_v25 = vpop.xlane.xlu0 %800 }
 0x14d   : > { %947 = vadd.xlane.f32.xlu2 %v946_v50  ;;  %v843_v38 = vsub.f32 %v1944_v12, %v801_v25  ;;  %v844_v51 = vsub.f32 %v1946_v17, %v801_v25 }
 0x14f   : > { %v822_v41 = vpop.xlane.xlu2 %821  ;;  %v1511_v43 = vpop.eup %1510  ;;  %v883_v3 = vmul.f32 1.442695, %v843_v38  ;;  %v885_v44 = vmul.f32 1.442695, %v844_v51 }
 0x150   : > { %v857_v27 = vsub.f32 %v1953_v35, %v822_v41  ;;  %v858_v13 = vsub.f32 %v1957_v10, %v822_v41  ;;  %v1513_v48 = vpop.eup %1512 }
 0x151   : > { %1514 = vpow2.f32 %v883_v3  ;;  %v2071_v8 = vadd.f32 %v1513_v48, %v1511_v43 }
 0x152   : > { %v911_v52 = vmul.f32 1.442695, %v857_v27  ;;  %v913_v11 = vmul.f32 1.442695, %v858_v13  ;;  %1516 = vpow2.f32 %v885_v44 }
 0x154   : > { %1518 = vpow2.f32 %v911_v52  ;;  %v834_v12 = vpop.xlane.xlu0 %833 }
 0x155   : > { %1520 = vpow2.f32 %v913_v11  ;;  %956 = vadd.xlane.f32.xlu2 %v2013_v36  ;;  %v865_v17 = vsub.f32 %v1963_v30, %v834_v12  ;;  %v866_v45 = vsub.f32 %v1965_v31, %v834_v12 }
 0x157   : > { %v831_v56 = vpop.xlane.xlu2 %830  ;;  %v1515_v35 = vpop.eup %1514  ;;  %v927_v54 = vmul.f32 1.442695, %v865_v17  ;;  %v929_v10 = vmul.f32 1.442695, %v866_v45 }
 0x158   : > { %v863_v6 = vsub.f32 %v1967_v32, %v831_v56  ;;  %v864_v7 = vsub.f32 %v1969_v34, %v831_v56  ;;  %v1517_v57 = vpop.eup %1516  ;;  %v983_v60 = vpack.c.bf16 %v1507_v55, %v1515_v35 }
 0x159   : > { %1522 = vpow2.f32 %v927_v54  ;;  %v984_v18 = vpack.c.bf16 %v1509_v37, %v1517_v57  ;;  %v943_v30 = vadd.f32 %v1517_v57, %v1515_v35 }
 0x15a   : > { %v1519_v61 = vpop.eup %1518  ;;  %v923_v63 = vmul.f32 1.442695, %v863_v6  ;;  %v925_v1 = vmul.f32 1.442695, %v864_v7  ;;  %1524 = vpow2.f32 %v929_v10  ;;  %1141 = vmatmul.bf16.gmra.mxu0 %v983_v60 }
 0x15b   : > { %v1521_v36 = vpop.eup %1520  ;;  %v989_v31 = vpack.c.bf16 %v1519_v61, %v1511_v43  ;;  %1190 = vmatmul.bf16.gmra.mxu1 %v984_v18  ;;  %944 = vadd.xlane.f32.xlu1 %v943_v30 }
 0x15c   : > { %1526 = vpow2.f32 %v923_v63  ;;  %v990_v19 = vpack.c.bf16 %v1521_v36, %v1513_v48  ;;  %v964_v4 = vadd.f32 %v1521_v36, %v1519_v61 }
 0x15d   : > { %1528 = vpow2.f32 %v925_v1  ;;  %1156 = vmatmul.bf16.gmra.mxu2 %v989_v31 }
 0x15e   : > { %1205 = vmatmul.bf16.gmra.mxu3 %v990_v19  ;;  %965 = vadd.xlane.f32.xlu2 %v964_v4 }
 0x15f   : > { %v1523_v32 = vpop.eup %1522 }
 0x160   : > { %v1525_v34 = vpop.eup %1524 }
 0x161   : > { %v2078_v14 = vadd.f32 %v1525_v34, %v1523_v32 }
 0x162   : > { %v1527_v9 = vpop.eup %1526 }
 0x163   : > { %v1529_v33 = vpop.eup %1528  ;;  %v993_v24 = vpack.c.bf16 %v1523_v32, %v1527_v9 }
 0x164   : > { %v973_v47 = vadd.f32 %v1529_v33, %v1527_v9  ;;  %v994_v0 = vpack.c.bf16 %v1525_v34, %v1529_v33 }
 0x166   : > { %974 = vadd.xlane.f32.xlu2 %v973_v47 }
 0x16d   : > { %1161 = vmatmul.bf16.gmra.mxu2 %v991_v23 }
 0x16e   : > { %1210 = vmatmul.bf16.gmra.mxu3 %v992_v16 }
 0x17d   : > { %1166 = vmatmul.bf16.gmra.mxu2 %v993_v24 }
 0x17e   : > { %1215 = vmatmul.bf16.gmra.mxu3 %v994_v0 }
 0x191   : > { %v807_v22 = vpop.xlane.xlu1 %806 }
 0x192   : > { %v847_v26 = vsub.f32 %v2027_v28, %v807_v22  ;;  %v848_v2 = vsub.f32 %v2029_v20, %v807_v22  ;;  %v933_v42 = vpop.xlane.xlu0 %932 }
 0x194   : > { %v891_v58 = vmul.f32 1.442695, %v847_v26  ;;  %v893_v59 = vmul.f32 1.442695, %v848_v2  ;;  %v810_v5 = vpop.xlane.xlu2 %809 }
 0x195   : > { %v849_v46 = vsub.f32 %v2033_v39, %v810_v5  ;;  %v850_v53 = vsub.f32 %v2035_v40, %v810_v5 }
 0x196   : > { %1530 = vpow2.f32 %v891_v58 }
 0x197   : > { %1532 = vpow2.f32 %v893_v59  ;;  %v895_v21 = vmul.f32 1.442695, %v849_v46  ;;  %v897_v29 = vmul.f32 1.442695, %v850_v53  ;;  %v1152_v55 = vpop.f32.mrf.mxu2 }
 0x198   : > { %1534 = vrcp.f32 %v933_v42  ;;  %v1201_v37 = vpop.f32.mrf.mxu3 }
 0x199   : > { %1536 = vpow2.f32 %v895_v21  ;;  %v936_v51 = vpop.xlane.xlu1 %935  ;;  %v1202_v30 = vadd.f32 %v1201_v37, %v1152_v55 }
 0x19a   : > { %1538 = vpow2.f32 %v897_v29 }
 0x19b   : > { %v1132_v28 = vpop.f32.mrf.mxu0  ;;  %1540 = vrcp.f32 %v936_v51 }
 0x19c   : > { %v1531_v20 = vpop.eup %1530  ;;  %v1181_v50 = vpop.f32.mrf.mxu1 }
 0x19d   : > { %v1533_v25 = vpop.eup %1532  ;;  %v1182_v38 = vadd.f32 %v1181_v50, %v1132_v28 }
 0x19e   : > { %v1535_v41 = vpop.eup %1534  ;;  %v949_v39 = vadd.f32 %v1533_v25, %v1531_v20 }
 0x19f   : > { %v1237_v40 = vmul.f32 %v1535_v41, %v1182_v38  ;;  %v1537_v43 = vpop.eup %1536  ;;  %v1154_v3 = vpop.f32.mrf.mxu2 }
 0x1a0   : > { %950 = vadd.xlane.f32.xlu0 %v949_v39  ;;  %v1539_v44 = vpop.eup %1538  ;;  %v1203_v27 = vpop.f32.mrf.mxu3  ;;  %v985_v13 = vpack.c.bf16 %v1537_v43, %v1531_v20 }
 0x1a1   : > { %1253 = vst [vmem:[%s2092_s23] sm:$0xff] %v1237_v40  ;;  %v2095_v48 = vadd.f32 %v1203_v27, %v1154_v3  ;;  %v986_v52 = vpack.c.bf16 %v1539_v44, %v1533_v25  ;;  %v952_v11 = vadd.f32 %v1539_v44, %v1537_v43  ;;  %v1541_v56 = vpop.eup %1540  ;;  %v939_v54 = vpop.xlane.xlu2 %938 }
 0x1a2   : > { %1146 = vmatmul.bf16.gmra.mxu0 %v985_v13  ;;  %1542 = vrcp.f32 %v939_v54 }
 0x1a3   : > { %v1134_v12 = vpop.f32.mrf.mxu0  ;;  %1195 = vmatmul.bf16.gmra.mxu1 %v986_v52  ;;  %953 = vadd.xlane.f32.xlu1 %v952_v11 }
 0x1a4   : > { %v1183_v17 = vpop.f32.mrf.mxu1 }
 0x1a5   : > { %v1184_v45 = vadd.f32 %v1183_v17, %v1134_v12 }
 0x1a7   : > { %v1238_v35 = vmul.f32 %v1541_v56, %v1184_v45 }
 0x1a8   : > { %959 = vadd.xlane.f32.xlu0 %v2020_v49  ;;  %v942_v7 = vpop.xlane.xlu0 %941  ;;  %v1543_v60 = vpop.eup %1542 }
 0x1a9   : > { %1254 = vst [vmem:[%s2092_s23 + $0x8] sm:$0xff] %v1238_v35  ;;  %1544 = vrcp.f32 %v942_v7 }
 0x1ab   : > { %962 = vadd.xlane.f32.xlu1 %v2071_v8 }
 0x1af   : > { %v1545_v1 = vpop.eup %1544 }
 0x1b0   : > { %968 = vadd.xlane.f32.xlu0 %v2053_v15 }
 0x1b1   : > { %v1137_v10 = vpop.f32.mrf.mxu0 }
 0x1b2   : > { %v1186_v6 = vpop.f32.mrf.mxu1 }
 0x1b3   : > { %v1187_v57 = vadd.f32 %v1186_v6, %v1137_v10  ;;  %971 = vadd.xlane.f32.xlu1 %v2063_v62 }
 0x1b5   : > { %v1239_v61 = vmul.f32 %v1543_v60, %v1187_v57 }
 0x1b7   : > { %1255 = vst [vmem:[%s2092_s23 + $0x10] sm:$0xff] %v1239_v61 }
 0x1b8   : > { %977 = vadd.xlane.f32.xlu0 %v2078_v14 }
 0x1b9   : > { %v1139_v49 = vpop.f32.mrf.mxu0 }
 0x1ba   : > { %v1188_v63 = vpop.f32.mrf.mxu1 }
 0x1bb   : > { %v1189_v8 = vadd.f32 %v1188_v63, %v1139_v49 }
 0x1bd   : > { %v1240_v18 = vmul.f32 %v1545_v1, %v1189_v8 }
 0x1bf   : > { %1256 = vst [vmem:[%s2092_s23 + $0x18] sm:$0xff] %v1240_v18 }
 0x1c0   : > { %v948_v15 = vpop.xlane.xlu2 %947 }
 0x1c8   : > { %v957_v36 = vpop.xlane.xlu2 %956 }
 0x1c9   : > { %1546 = vrcp.f32 %v957_v36 }
 0x1ce   : > { %v945_v19 = vpop.xlane.xlu1 %944 }
 0x1cf   : > { %v1547_v31 = vpop.eup %1546  ;;  %1548 = vrcp.f32 %v945_v19 }
 0x1d0   : > { %v1245_v62 = vmul.f32 %v1547_v31, %v1202_v30  ;;  %1550 = vrcp.f32 %v948_v15 }
 0x1d1   : > { %v966_v24 = vpop.xlane.xlu2 %965 }
 0x1d2   : > { %1261 = vst [vmem:[%s2092_s23 + $0x40] sm:$0xff] %v1245_v62  ;;  %1552 = vrcp.f32 %v966_v24 }
 0x1d5   : > { %v1549_v9 = vpop.eup %1548 }
 0x1d6   : > { %v1551_v26 = vpop.eup %1550 }
 0x1d7   : > { %v1142_v4 = vpop.f32.mrf.mxu0 }
 0x1d8   : > { %v1191_v32 = vpop.f32.mrf.mxu1  ;;  %v1553_v5 = vpop.eup %1552 }
 0x1d9   : > { %v1192_v34 = vadd.f32 %v1191_v32, %v1142_v4  ;;  %v975_v37 = vpop.xlane.xlu2 %974 }
 0x1da   : > { %1554 = vrcp.f32 %v975_v37 }
 0x1db   : > { %v1241_v14 = vmul.f32 %v1549_v9, %v1192_v34 }
 0x1dd   : > { %1257 = vst [vmem:[%s2092_s23 + $0x20] sm:$0xff] %v1241_v14 }
 0x1df   : > { %v1144_v47 = vpop.f32.mrf.mxu0 }
 0x1e0   : > { %v1157_v33 = vpop.f32.mrf.mxu2  ;;  %v1193_v16 = vpop.f32.mrf.mxu1 }
 0x1e1   : > { %v1206_v23 = vpop.f32.mrf.mxu3  ;;  %v1194_v22 = vadd.f32 %v1193_v16, %v1144_v47  ;;  %v1555_v25 = vpop.eup %1554 }
 0x1e2   : > { %v1207_v0 = vadd.f32 %v1206_v23, %v1157_v33 }
 0x1e3   : > { %v1242_v2 = vmul.f32 %v1551_v26, %v1194_v22 }
 0x1e5   : > { %1258 = vst [vmem:[%s2092_s23 + $0x28] sm:$0xff] %v1242_v2 }
 0x1e8   : > { %v1159_v58 = vpop.f32.mrf.mxu2 }
 0x1e9   : > { %v1208_v59 = vpop.f32.mrf.mxu3 }
 0x1ea   : > { %v1209_v42 = vadd.f32 %v1208_v59, %v1159_v58 }
 0x1ec   : > { %v1248_v46 = vmul.f32 %v1553_v5, %v1209_v42 }
 0x1ee   : > { %1264 = vst [vmem:[%s2092_s23 + $0x58] sm:$0xff] %v1248_v46 }
 0x1f0   : > { %v1162_v53 = vpop.f32.mrf.mxu2 }
 0x1f1   : > { %v1211_v21 = vpop.f32.mrf.mxu3 }
 0x1f2   : > { %v1212_v54 = vadd.f32 %v1211_v21, %v1162_v53 }
 0x1f8   : > { %v1164_v29 = vpop.f32.mrf.mxu2 }
 0x1f9   : > { %v1213_v55 = vpop.f32.mrf.mxu3 }
 0x1fa   : > { %v1214_v49 = vadd.f32 %v1213_v55, %v1164_v29 }
 0x200   : > { %v1167_v28 = vpop.f32.mrf.mxu2 }
 0x201   : > { %v1216_v20 = vpop.f32.mrf.mxu3 }
 0x202   : > { %v1217_v50 = vadd.f32 %v1216_v20, %v1167_v28 }
 0x204   : > { %v1251_v38 = vmul.f32 %v1555_v25, %v1217_v50 }
 0x206   : > { %1267 = vst [vmem:[%s2092_s23 + $0x70] sm:$0xff] %v1251_v38 }
 0x208   : > { %v1169_v8 = vpop.f32.mrf.mxu2 }
 0x209   : > { %v1218_v1 = vpop.f32.mrf.mxu3 }
 0x20a   : > { %v1219_v15 = vadd.f32 %v1218_v1, %v1169_v8 }
 0x213   : > { %v951_v51 = vpop.xlane.xlu0 %950 }
 0x216   : > { %v954_v41 = vpop.xlane.xlu1 %953 }
 0x21b   : > { %v960_v39 = vpop.xlane.xlu0 %959 }
 0x21c   : > { %1556 = vrcp.f32 %v960_v39 }
 0x21d   : > { %1558 = vrcp.f32 %v951_v51 }
 0x21e   : > { %v963_v40 = vpop.xlane.xlu1 %962 }
 0x21f   : > { %1560 = vrcp.f32 %v963_v40  ;;  %v1147_v43 = vpop.f32.mrf.mxu0 }
 0x220   : > { %v1196_v3 = vpop.f32.mrf.mxu1 }
 0x221   : > { %v1197_v27 = vadd.f32 %v1196_v3, %v1147_v43 }
 0x222   : > { %v1557_v44 = vpop.eup %1556 }
 0x223   : > { %v1559_v13 = vpop.eup %1558  ;;  %v1246_v52 = vmul.f32 %v1557_v44, %v2095_v48  ;;  %v969_v11 = vpop.xlane.xlu0 %968 }
 0x224   : > { %v1243_v12 = vmul.f32 %v1559_v13, %v1197_v27  ;;  %1562 = vrcp.f32 %v969_v11 }
 0x225   : > { %1564 = vrcp.f32 %v954_v41  ;;  %1262 = vst [vmem:[%s2092_s23 + $0x48] sm:$0xff] %v1246_v52  ;;  %v1561_v17 = vpop.eup %1560 }
 0x226   : > { %1259 = vst [vmem:[%s2092_s23 + $0x30] sm:$0xff] %v1243_v12  ;;  %v1247_v45 = vmul.f32 %v1561_v17, %v1207_v0  ;;  %v972_v56 = vpop.xlane.xlu1 %971 }
 0x227   : > { %1566 = vrcp.f32 %v972_v56  ;;  %v1149_v35 = vpop.f32.mrf.mxu0 }
 0x228   : > { %1263 = vst [vmem:[%s2092_s23 + $0x50] sm:$0xff] %v1247_v45  ;;  %v1198_v10 = vpop.f32.mrf.mxu1 }
 0x229   : > { %v1199_v7 = vadd.f32 %v1198_v10, %v1149_v35 }
 0x22a   : > { %v1563_v6 = vpop.eup %1562 }
 0x22b   : > { %v1565_v48 = vpop.eup %1564  ;;  %v1249_v57 = vmul.f32 %v1563_v6, %v1212_v54  ;;  %v978_v60 = vpop.xlane.xlu0 %977 }
 0x22c   : > { %v1244_v61 = vmul.f32 %v1565_v48, %v1199_v7  ;;  %1568 = vrcp.f32 %v978_v60 }
 0x22d   : > { %1265 = vst [vmem:[%s2092_s23 + $0x60] sm:$0xff] %v1249_v57  ;;  %v1567_v63 = vpop.eup %1566 }
 0x22e   : > { %1260 = vst [vmem:[%s2092_s23 + $0x38] sm:$0xff] %v1244_v61  ;;  %v1250_v18 = vmul.f32 %v1567_v63, %v1214_v49 }
 0x230   : > { %1266 = vst [vmem:[%s2092_s23 + $0x68] sm:$0xff] %v1250_v18 }
 0x232   : > { %v1569_v36 = vpop.eup %1568 }
 0x233   : > { %v1252_v30 = vmul.f32 %v1569_v36, %v1219_v15 }
 0x235   : > { %1268 = vst [vmem:[%s2092_s23 + $0x78] sm:$0xff] %v1252_v30 }
 0x236 PF: > { %s15_s18 = sadd.s32 1, %s1576_s18  }
 0x237   : > { %p12_p5 = scmp.ge.s32.totalorder %s15_s18, 4  }
 0x239   :  { %14 = sbr.rel (!%p12_p5) target bundleno = 1 (0x1), region = 76 }

</bundles_post_ra>
